<compile_context>
chip_gen: v5e
topology: v5e:2x2
jax: 0.10.0
libtpu: 0.0.40
codegen_flags: <defaults>
</compile_context>

<pallas_src>
import jax
import jax.numpy as jnp
import numpy as np
from jax.experimental import pallas as pl
from jax.experimental.pallas import tpu as pltpu


def stdg_cgru_kernel(x_ref, a_ref, thbd_ref, bias_ref, whzr_ref, whc_ref,
                     convw_ref, convb_ref, out_ref):
    N = a_ref.shape[2]
    K = thbd_ref.shape[0]
    H = whc_ref.shape[0]
    T = thbd_ref.shape[2] // (3 * H)

    xb = x_ref[0]                                        # (N, T*C), cols ordered (t, c)
    A = a_ref[0]                                         # (K*N, N): stacked (cheb[k]*STDG[b]).T

    # ---- graph mixing for ALL timesteps and all Chebyshev orders: one matmul ----
    G = jnp.dot(A, xb, preferred_element_type=jnp.float32)        # (K*N, T*C), rows (k, n)

    # ---- x-side GRU preactivations for ALL timesteps (Theta fused with [Wxz|Wxr|Wxc]) ----
    xpre = jnp.dot(G[0:N], thbd_ref[0], preferred_element_type=jnp.float32)     # (N, T*3H)
    for k in range(1, K):
        xpre = xpre + jnp.dot(G[k * N:(k + 1) * N], thbd_ref[k],
                              preferred_element_type=jnp.float32)
    xpre = xpre + bias_ref[...]                          # fold [bz|br|bc] once (broadcast add)

    whzr = whzr_ref[...]                                 # (H, 2H) = [Whz | Whr]
    whc = whc_ref[...]                                   # (H, H)

    # ---- GRU recurrence: only two small hidden-state matmuls per step remain on the chain ----
    # t = 0 (initial state is zero -> skip the hidden matmuls entirely)
    zr = jax.nn.sigmoid(xpre[:, 0:2 * H])
    z = zr[:, :H]
    hc = jnp.tanh(xpre[:, 2 * H:3 * H])
    state = (1.0 - z) * hc

    for t in range(1, T):                                # T=8: full unroll
        base = 3 * H * t
        xzr = xpre[:, base:base + 2 * H]                 # precomputed, off the serial chain
        xc = xpre[:, base + 2 * H:base + 3 * H]
        zr = jax.nn.sigmoid(xzr + jnp.dot(state, whzr, preferred_element_type=jnp.float32))
        z = zr[:, :H]
        r = zr[:, H:]
        hc = jnp.tanh(xc + jnp.dot(r * state, whc, preferred_element_type=jnp.float32))
        state = z * state + (1.0 - z) * hc

    # ---- 1x1 Conv2d head on the LAST hidden state: single lane-dense (N, T*H) store ----
    out_ref[0] = (jnp.tile(state, (1, T)) * convw_ref[...] + convb_ref[...]).astype(out_ref.dtype)


def stdg_cgru_forward(x_bnct, stdg, cheb, theta, gru_params, conv_w, conv_b):
    B, N, C, T = x_bnct.shape
    K = cheb.shape[0]
    H = theta.shape[2]
    wxz, whz, bz, wxr, whr, br, wxc, whc, bc = gru_params
    f32 = jnp.float32

    # ---- layout / weight prep (tiny, done once per call outside the kernel) ----
    x_rows = jnp.transpose(x_bnct, (0, 1, 3, 2)).reshape(B, N, T * C)            # cols (t, c)
    op = jnp.transpose(cheb[None, :, :, :] * stdg[:, None, :, :], (0, 1, 3, 2))  # (B, K, N, N) transposed
    a_stack = op.reshape(B, K * N, N)                                            # per-b stacked operator

    wx_all = jnp.concatenate([wxz, wxr, wxc], axis=1)                            # (H, 3H)
    theta_f = jnp.einsum('kch,hj->kcj', theta, wx_all)                           # Theta fused with x-side GRU weights
    theta_bd = jnp.einsum('tu,kcj->ktcuj', jnp.eye(T, dtype=f32), theta_f)
    theta_bd = theta_bd.reshape(K, T * C, T * 3 * H)                             # block-diag over t

    bias_row = jnp.tile(jnp.concatenate([bz, br, bc], axis=1), (1, T))           # (1, T*3H)
    wh_zr = jnp.concatenate([whz, whr], axis=1)                                  # (H, 2H)
    convw_row = jnp.repeat(conv_w, H)[None, :]                                   # (1, T*H)
    convb_row = jnp.repeat(conv_b, H)[None, :]

    flops = B * (2 * (K * N) * N * (T * C)
                 + K * 2 * N * (T * C) * (T * 3 * H)
                 + (T - 1) * 2 * (N * H * 2 * H + N * H * H))
    bytes_accessed = 4 * (x_rows.size + a_stack.size + theta_bd.size + bias_row.size
                          + wh_zr.size + whc.size + 2 * convw_row.size + B * N * T * H)
    cost = pl.CostEstimate(flops=flops, transcendentals=B * T * N * 3 * H,
                           bytes_accessed=bytes_accessed)

    in_specs = [
        pl.BlockSpec((1, N, T * C), lambda b: (b, 0, 0)),            # x rows (per batch)
        pl.BlockSpec((1, K * N, N), lambda b: (b, 0, 0)),            # stacked graph operator (per batch)
        pl.BlockSpec((K, T * C, T * 3 * H), lambda b: (0, 0, 0)),    # fused Theta (block-diag over t)
        pl.BlockSpec((1, T * 3 * H), lambda b: (0, 0)),              # fused GRU bias row
        pl.BlockSpec((H, 2 * H), lambda b: (0, 0)),                  # [Whz | Whr]
        pl.BlockSpec((H, H), lambda b: (0, 0)),                      # Whc
        pl.BlockSpec((1, T * H), lambda b: (0, 0)),                  # conv weight row
        pl.BlockSpec((1, T * H), lambda b: (0, 0)),                  # conv bias row
    ]

    out_flat = pl.pallas_call(
        stdg_cgru_kernel,
        out_shape=jax.ShapeDtypeStruct((B, N, T * H), f32),          # lane-dense output
        grid=(B,),
        in_specs=in_specs,
        out_specs=pl.BlockSpec((1, N, T * H), lambda b: (b, 0, 0)),
        compiler_params=pltpu.CompilerParams(
            dimension_semantics=("parallel",),                       # uses both TCs on v7x
            vmem_limit_bytes=32 * 1024 * 1024),
        cost_estimate=cost,
    )(x_rows, a_stack, theta_bd, bias_row, wh_zr, whc, convw_row, convb_row)

    # (B, N, T*H) -> (B, T, N, H)
    return jnp.transpose(out_flat.reshape(B, N, T, H), (0, 2, 1, 3))


def reference_forward(x_bnct, stdg, cheb, theta, gru_params, conv_w, conv_b):
    """Pure-JAX replica of the PyTorch forward (same inferred GRU cell)."""
    B, N, C, T = x_bnct.shape
    K, _, H = theta.shape
    wxz, whz, bz, wxr, whr, br, wxc, whc, bc = gru_params
    state = jnp.zeros((B, N, H), jnp.float32)
    for t in range(T):
        gs = x_bnct[:, :, :, t]                               # (B, N, C)
        out = jnp.zeros((B, N, H), jnp.float32)
        for k in range(K):
            tk = cheb[k][None] * stdg                         # (B, N, N)
            rhs = jnp.einsum('bnm,bnc->bmc', tk, gs)          # permute(0,2,1) @ gs
            out = out + jnp.einsum('bmc,ch->bmh', rhs, theta[k])
        z = jax.nn.sigmoid(out @ wxz + state @ whz + bz)
        r = jax.nn.sigmoid(out @ wxr + state @ whr + br)
        hc = jnp.tanh(out @ wxc + (r * state) @ whc + bc)
        state = z * state + (1.0 - z) * hc
    return (conv_w[None, :, None, None] * state[:, None, :, :]
            + conv_b[None, :, None, None])


if __name__ == "__main__":
    B, N, C, T, H, K = 2, 16, 4, 8, 32, 3      # batch, nodes, in_ch, timesteps, out_ch/hidden, cheb order

    key = jax.random.PRNGKey(0)
    ks = jax.random.split(key, 16)
    x = jax.random.normal(ks[0], (B, N, C, T), jnp.float32)
    stdg = jax.random.normal(ks[1], (B, N, N), jnp.float32)
    cheb = jax.random.normal(ks[2], (K, N, N), jnp.float32)

    theta = 0.1 * jax.random.normal(ks[3], (K, C, H), jnp.float32)
    wxz = 0.1 * jax.random.normal(ks[4], (H, H), jnp.float32)
    whz = 0.1 * jax.random.normal(ks[5], (H, H), jnp.float32)
    bz = 0.1 * jax.random.normal(ks[6], (1, H), jnp.float32)
    wxr = 0.1 * jax.random.normal(ks[7], (H, H), jnp.float32)
    whr = 0.1 * jax.random.normal(ks[8], (H, H), jnp.float32)
    br = 0.1 * jax.random.normal(ks[9], (1, H), jnp.float32)
    wxc = 0.1 * jax.random.normal(ks[10], (H, H), jnp.float32)
    whc = 0.1 * jax.random.normal(ks[11], (H, H), jnp.float32)
    bc = 0.1 * jax.random.normal(ks[12], (1, H), jnp.float32)
    conv_w = jax.random.normal(ks[13], (T,), jnp.float32)     # Conv2d(1, T, 1x1) weight (T,1,1,1) squeezed
    conv_b = jax.random.normal(ks[14], (T,), jnp.float32)     # Conv2d bias (T,)

    gru_params = (wxz, whz, bz, wxr, whr, br, wxc, whc, bc)

    out = stdg_cgru_forward(x, stdg, cheb, theta, gru_params, conv_w, conv_b)
    out = jax.block_until_ready(out)

    ref = reference_forward(x, stdg, cheb, theta, gru_params, conv_w, conv_b)
    assert out.shape == (B, T, N, H), out.shape
    if not np.allclose(np.asarray(out), np.asarray(ref), rtol=1e-3, atol=1e-3):
        raise RuntimeError("Pallas kernel does not match pure-JAX reference")

    print("KERNEL_OK")
</pallas_src>

<mosaic_0001>
module attributes {stable_mosaic.version = 11 : i64} {
  func.func @stdg_cgru_kernel(%arg0: i32, %arg1: memref<1x16x32xf32, #tpu.memory_space<vmem>>, %arg2: memref<1x48x16xf32, #tpu.memory_space<vmem>>, %arg3: memref<3x32x768xf32, #tpu.memory_space<vmem>>, %arg4: memref<1x768xf32, #tpu.memory_space<vmem>>, %arg5: memref<32x64xf32, #tpu.memory_space<vmem>>, %arg6: memref<32x32xf32, #tpu.memory_space<vmem>>, %arg7: memref<1x256xf32, #tpu.memory_space<vmem>>, %arg8: memref<1x256xf32, #tpu.memory_space<vmem>>, %arg9: memref<1x16x256xf32, #tpu.memory_space<vmem>>) attributes {dimension_semantics = [#tpu.dimension_semantics<parallel>], iteration_bounds = array<i64: 2>, scalar_prefetch = 0 : i64, scratch_operands = 0 : i64, tpu.core_type = #tpu.core_type<tc>, window_params = [{transform_indices = @transform_0, window_bounds = array<i64: 1, 16, 32>}, {transform_indices = @transform_1, window_bounds = array<i64: 1, 48, 16>}, {pipeline_mode = #tpu.pipeline_mode<synchronous>, transform_indices = @transform_2, window_bounds = array<i64: 3, 32, 768>}, {pipeline_mode = #tpu.pipeline_mode<synchronous>, transform_indices = @transform_3, window_bounds = array<i64: 1, 768>}, {pipeline_mode = #tpu.pipeline_mode<synchronous>, transform_indices = @transform_4, window_bounds = array<i64: 32, 64>}, {pipeline_mode = #tpu.pipeline_mode<synchronous>, transform_indices = @transform_5, window_bounds = array<i64: 32, 32>}, {pipeline_mode = #tpu.pipeline_mode<synchronous>, transform_indices = @transform_6, window_bounds = array<i64: 1, 256>}, {pipeline_mode = #tpu.pipeline_mode<synchronous>, transform_indices = @transform_7, window_bounds = array<i64: 1, 256>}, {transform_indices = @transform_8, window_bounds = array<i64: 1, 16, 256>}]} {
    %c0 = arith.constant 0 : index
    %c0_0 = arith.constant 0 : index
    %c0_1 = arith.constant 0 : index
    %0 = vector.load %arg1[%c0, %c0_0, %c0_1] : memref<1x16x32xf32, #tpu.memory_space<vmem>>, vector<1x16x32xf32>
    %1 = vector.shape_cast %0 : vector<1x16x32xf32> to vector<16x32xf32>
    %c0_2 = arith.constant 0 : index
    %c0_3 = arith.constant 0 : index
    %c0_4 = arith.constant 0 : index
    %2 = vector.load %arg2[%c0_2, %c0_3, %c0_4] : memref<1x48x16xf32, #tpu.memory_space<vmem>>, vector<1x48x16xf32>
    %3 = vector.shape_cast %2 : vector<1x48x16xf32> to vector<48x16xf32>
    %cst = arith.constant dense<0.000000e+00> : vector<48x32xf32>
    %4 = tpu.matmul %3, %1, %cst {dimension_numbers = #tpu.dot_dimension_numbers<[1], [0], [0], [1], [0, 0, 1, 1], [], []>} : vector<48x16xf32>, vector<16x32xf32>, vector<48x32xf32> -> vector<48x32xf32>
    %5 = vector.extract_strided_slice %4 {offsets = [0, 0], sizes = [16, 32], strides = [1, 1]} : vector<48x32xf32> to vector<16x32xf32>
    %c0_5 = arith.constant 0 : index
    %c0_6 = arith.constant 0 : index
    %c0_7 = arith.constant 0 : index
    %6 = vector.load %arg3[%c0_5, %c0_6, %c0_7] : memref<3x32x768xf32, #tpu.memory_space<vmem>>, vector<1x32x768xf32>
    %7 = vector.shape_cast %6 : vector<1x32x768xf32> to vector<32x768xf32>
    %cst_8 = arith.constant dense<0.000000e+00> : vector<16x768xf32>
    %8 = tpu.matmul %5, %7, %cst_8 {dimension_numbers = #tpu.dot_dimension_numbers<[1], [0], [0], [1], [0, 0, 1, 1], [], []>} : vector<16x32xf32>, vector<32x768xf32>, vector<16x768xf32> -> vector<16x768xf32>
    %9 = vector.extract_strided_slice %4 {offsets = [16, 0], sizes = [16, 32], strides = [1, 1]} : vector<48x32xf32> to vector<16x32xf32>
    %c1 = arith.constant 1 : index
    %c0_9 = arith.constant 0 : index
    %c0_10 = arith.constant 0 : index
    %10 = vector.load %arg3[%c1, %c0_9, %c0_10] : memref<3x32x768xf32, #tpu.memory_space<vmem>>, vector<1x32x768xf32>
    %11 = vector.shape_cast %10 : vector<1x32x768xf32> to vector<32x768xf32>
    %cst_11 = arith.constant dense<0.000000e+00> : vector<16x768xf32>
    %12 = tpu.matmul %9, %11, %cst_11 {dimension_numbers = #tpu.dot_dimension_numbers<[1], [0], [0], [1], [0, 0, 1, 1], [], []>} : vector<16x32xf32>, vector<32x768xf32>, vector<16x768xf32> -> vector<16x768xf32>
    %13 = arith.addf %8, %12 : vector<16x768xf32>
    %14 = vector.extract_strided_slice %4 {offsets = [32, 0], sizes = [16, 32], strides = [1, 1]} : vector<48x32xf32> to vector<16x32xf32>
    %c2 = arith.constant 2 : index
    %c0_12 = arith.constant 0 : index
    %c0_13 = arith.constant 0 : index
    %15 = vector.load %arg3[%c2, %c0_12, %c0_13] : memref<3x32x768xf32, #tpu.memory_space<vmem>>, vector<1x32x768xf32>
    %16 = vector.shape_cast %15 : vector<1x32x768xf32> to vector<32x768xf32>
    %cst_14 = arith.constant dense<0.000000e+00> : vector<16x768xf32>
    %17 = tpu.matmul %14, %16, %cst_14 {dimension_numbers = #tpu.dot_dimension_numbers<[1], [0], [0], [1], [0, 0, 1, 1], [], []>} : vector<16x32xf32>, vector<32x768xf32>, vector<16x768xf32> -> vector<16x768xf32>
    %18 = arith.addf %13, %17 : vector<16x768xf32>
    %c0_15 = arith.constant 0 : index
    %c0_16 = arith.constant 0 : index
    %19 = vector.load %arg4[%c0_15, %c0_16] : memref<1x768xf32, #tpu.memory_space<vmem>>, vector<1x768xf32>
    %20 = vector.broadcast %19 : vector<1x768xf32> to vector<16x768xf32>
    %21 = arith.addf %18, %20 : vector<16x768xf32>
    %c0_17 = arith.constant 0 : index
    %c0_18 = arith.constant 0 : index
    %22 = vector.load %arg5[%c0_17, %c0_18] : memref<32x64xf32, #tpu.memory_space<vmem>>, vector<32x64xf32>
    %c0_19 = arith.constant 0 : index
    %c0_20 = arith.constant 0 : index
    %23 = vector.load %arg6[%c0_19, %c0_20] : memref<32x32xf32, #tpu.memory_space<vmem>>, vector<32x32xf32>
    %24 = vector.extract_strided_slice %21 {offsets = [0, 0], sizes = [16, 64], strides = [1, 1]} : vector<16x768xf32> to vector<16x64xf32>
    %25 = arith.negf %24 : vector<16x64xf32>
    %26 = math.exp %25 : vector<16x64xf32>
    %cst_21 = arith.constant 1.000000e+00 : f32
    %27 = vector.broadcast %cst_21 : f32 to vector<16x64xf32>
    %28 = arith.addf %27, %26 : vector<16x64xf32>
    %29 = arith.divf %27, %28 : vector<16x64xf32>
    %30 = vector.extract_strided_slice %29 {offsets = [0, 0], sizes = [16, 32], strides = [1, 1]} : vector<16x64xf32> to vector<16x32xf32>
    %31 = vector.extract_strided_slice %21 {offsets = [0, 64], sizes = [16, 32], strides = [1, 1]} : vector<16x768xf32> to vector<16x32xf32>
    %32 = math.tanh %31 : vector<16x32xf32>
    %cst_22 = arith.constant 1.000000e+00 : f32
    %33 = vector.broadcast %cst_22 : f32 to vector<16x32xf32>
    %34 = arith.subf %33, %30 : vector<16x32xf32>
    %35 = arith.mulf %34, %32 : vector<16x32xf32>
    %36 = vector.extract_strided_slice %21 {offsets = [0, 96], sizes = [16, 64], strides = [1, 1]} : vector<16x768xf32> to vector<16x64xf32>
    %37 = vector.extract_strided_slice %21 {offsets = [0, 160], sizes = [16, 32], strides = [1, 1]} : vector<16x768xf32> to vector<16x32xf32>
    %cst_23 = arith.constant dense<0.000000e+00> : vector<16x64xf32>
    %38 = tpu.matmul %35, %22, %cst_23 {dimension_numbers = #tpu.dot_dimension_numbers<[1], [0], [0], [1], [0, 0, 1, 1], [], []>} : vector<16x32xf32>, vector<32x64xf32>, vector<16x64xf32> -> vector<16x64xf32>
    %39 = arith.addf %36, %38 : vector<16x64xf32>
    %40 = arith.negf %39 : vector<16x64xf32>
    %41 = math.exp %40 : vector<16x64xf32>
    %cst_24 = arith.constant 1.000000e+00 : f32
    %42 = vector.broadcast %cst_24 : f32 to vector<16x64xf32>
    %43 = arith.addf %42, %41 : vector<16x64xf32>
    %44 = arith.divf %42, %43 : vector<16x64xf32>
    %45 = vector.extract_strided_slice %44 {offsets = [0, 0], sizes = [16, 32], strides = [1, 1]} : vector<16x64xf32> to vector<16x32xf32>
    %46 = vector.extract_strided_slice %44 {offsets = [0, 32], sizes = [16, 32], strides = [1, 1]} : vector<16x64xf32> to vector<16x32xf32>
    %47 = arith.mulf %46, %35 : vector<16x32xf32>
    %cst_25 = arith.constant dense<0.000000e+00> : vector<16x32xf32>
    %48 = tpu.matmul %47, %23, %cst_25 {dimension_numbers = #tpu.dot_dimension_numbers<[1], [0], [0], [1], [0, 0, 1, 1], [], []>} : vector<16x32xf32>, vector<32x32xf32>, vector<16x32xf32> -> vector<16x32xf32>
    %49 = arith.addf %37, %48 : vector<16x32xf32>
    %50 = math.tanh %49 : vector<16x32xf32>
    %51 = arith.mulf %45, %35 : vector<16x32xf32>
    %cst_26 = arith.constant 1.000000e+00 : f32
    %52 = vector.broadcast %cst_26 : f32 to vector<16x32xf32>
    %53 = arith.subf %52, %45 : vector<16x32xf32>
    %54 = arith.mulf %53, %50 : vector<16x32xf32>
    %55 = arith.addf %51, %54 : vector<16x32xf32>
    %56 = vector.extract_strided_slice %21 {offsets = [0, 192], sizes = [16, 64], strides = [1, 1]} : vector<16x768xf32> to vector<16x64xf32>
    %57 = vector.extract_strided_slice %21 {offsets = [0, 256], sizes = [16, 32], strides = [1, 1]} : vector<16x768xf32> to vector<16x32xf32>
    %cst_27 = arith.constant dense<0.000000e+00> : vector<16x64xf32>
    %58 = tpu.matmul %55, %22, %cst_27 {dimension_numbers = #tpu.dot_dimension_numbers<[1], [0], [0], [1], [0, 0, 1, 1], [], []>} : vector<16x32xf32>, vector<32x64xf32>, vector<16x64xf32> -> vector<16x64xf32>
    %59 = arith.addf %56, %58 : vector<16x64xf32>
    %60 = arith.negf %59 : vector<16x64xf32>
    %61 = math.exp %60 : vector<16x64xf32>
    %cst_28 = arith.constant 1.000000e+00 : f32
    %62 = vector.broadcast %cst_28 : f32 to vector<16x64xf32>
    %63 = arith.addf %62, %61 : vector<16x64xf32>
    %64 = arith.divf %62, %63 : vector<16x64xf32>
    %65 = vector.extract_strided_slice %64 {offsets = [0, 0], sizes = [16, 32], strides = [1, 1]} : vector<16x64xf32> to vector<16x32xf32>
    %66 = vector.extract_strided_slice %64 {offsets = [0, 32], sizes = [16, 32], strides = [1, 1]} : vector<16x64xf32> to vector<16x32xf32>
    %67 = arith.mulf %66, %55 : vector<16x32xf32>
    %cst_29 = arith.constant dense<0.000000e+00> : vector<16x32xf32>
    %68 = tpu.matmul %67, %23, %cst_29 {dimension_numbers = #tpu.dot_dimension_numbers<[1], [0], [0], [1], [0, 0, 1, 1], [], []>} : vector<16x32xf32>, vector<32x32xf32>, vector<16x32xf32> -> vector<16x32xf32>
    %69 = arith.addf %57, %68 : vector<16x32xf32>
    %70 = math.tanh %69 : vector<16x32xf32>
    %71 = arith.mulf %65, %55 : vector<16x32xf32>
    %cst_30 = arith.constant 1.000000e+00 : f32
    %72 = vector.broadcast %cst_30 : f32 to vector<16x32xf32>
    %73 = arith.subf %72, %65 : vector<16x32xf32>
    %74 = arith.mulf %73, %70 : vector<16x32xf32>
    %75 = arith.addf %71, %74 : vector<16x32xf32>
    %76 = vector.extract_strided_slice %21 {offsets = [0, 288], sizes = [16, 64], strides = [1, 1]} : vector<16x768xf32> to vector<16x64xf32>
    %77 = vector.extract_strided_slice %21 {offsets = [0, 352], sizes = [16, 32], strides = [1, 1]} : vector<16x768xf32> to vector<16x32xf32>
    %cst_31 = arith.constant dense<0.000000e+00> : vector<16x64xf32>
    %78 = tpu.matmul %75, %22, %cst_31 {dimension_numbers = #tpu.dot_dimension_numbers<[1], [0], [0], [1], [0, 0, 1, 1], [], []>} : vector<16x32xf32>, vector<32x64xf32>, vector<16x64xf32> -> vector<16x64xf32>
    %79 = arith.addf %76, %78 : vector<16x64xf32>
    %80 = arith.negf %79 : vector<16x64xf32>
    %81 = math.exp %80 : vector<16x64xf32>
    %cst_32 = arith.constant 1.000000e+00 : f32
    %82 = vector.broadcast %cst_32 : f32 to vector<16x64xf32>
    %83 = arith.addf %82, %81 : vector<16x64xf32>
    %84 = arith.divf %82, %83 : vector<16x64xf32>
    %85 = vector.extract_strided_slice %84 {offsets = [0, 0], sizes = [16, 32], strides = [1, 1]} : vector<16x64xf32> to vector<16x32xf32>
    %86 = vector.extract_strided_slice %84 {offsets = [0, 32], sizes = [16, 32], strides = [1, 1]} : vector<16x64xf32> to vector<16x32xf32>
    %87 = arith.mulf %86, %75 : vector<16x32xf32>
    %cst_33 = arith.constant dense<0.000000e+00> : vector<16x32xf32>
    %88 = tpu.matmul %87, %23, %cst_33 {dimension_numbers = #tpu.dot_dimension_numbers<[1], [0], [0], [1], [0, 0, 1, 1], [], []>} : vector<16x32xf32>, vector<32x32xf32>, vector<16x32xf32> -> vector<16x32xf32>
    %89 = arith.addf %77, %88 : vector<16x32xf32>
    %90 = math.tanh %89 : vector<16x32xf32>
    %91 = arith.mulf %85, %75 : vector<16x32xf32>
    %cst_34 = arith.constant 1.000000e+00 : f32
    %92 = vector.broadcast %cst_34 : f32 to vector<16x32xf32>
    %93 = arith.subf %92, %85 : vector<16x32xf32>
    %94 = arith.mulf %93, %90 : vector<16x32xf32>
    %95 = arith.addf %91, %94 : vector<16x32xf32>
    %96 = vector.extract_strided_slice %21 {offsets = [0, 384], sizes = [16, 64], strides = [1, 1]} : vector<16x768xf32> to vector<16x64xf32>
    %97 = vector.extract_strided_slice %21 {offsets = [0, 448], sizes = [16, 32], strides = [1, 1]} : vector<16x768xf32> to vector<16x32xf32>
    %cst_35 = arith.constant dense<0.000000e+00> : vector<16x64xf32>
    %98 = tpu.matmul %95, %22, %cst_35 {dimension_numbers = #tpu.dot_dimension_numbers<[1], [0], [0], [1], [0, 0, 1, 1], [], []>} : vector<16x32xf32>, vector<32x64xf32>, vector<16x64xf32> -> vector<16x64xf32>
    %99 = arith.addf %96, %98 : vector<16x64xf32>
    %100 = arith.negf %99 : vector<16x64xf32>
    %101 = math.exp %100 : vector<16x64xf32>
    %cst_36 = arith.constant 1.000000e+00 : f32
    %102 = vector.broadcast %cst_36 : f32 to vector<16x64xf32>
    %103 = arith.addf %102, %101 : vector<16x64xf32>
    %104 = arith.divf %102, %103 : vector<16x64xf32>
    %105 = vector.extract_strided_slice %104 {offsets = [0, 0], sizes = [16, 32], strides = [1, 1]} : vector<16x64xf32> to vector<16x32xf32>
    %106 = vector.extract_strided_slice %104 {offsets = [0, 32], sizes = [16, 32], strides = [1, 1]} : vector<16x64xf32> to vector<16x32xf32>
    %107 = arith.mulf %106, %95 : vector<16x32xf32>
    %cst_37 = arith.constant dense<0.000000e+00> : vector<16x32xf32>
    %108 = tpu.matmul %107, %23, %cst_37 {dimension_numbers = #tpu.dot_dimension_numbers<[1], [0], [0], [1], [0, 0, 1, 1], [], []>} : vector<16x32xf32>, vector<32x32xf32>, vector<16x32xf32> -> vector<16x32xf32>
    %109 = arith.addf %97, %108 : vector<16x32xf32>
    %110 = math.tanh %109 : vector<16x32xf32>
    %111 = arith.mulf %105, %95 : vector<16x32xf32>
    %cst_38 = arith.constant 1.000000e+00 : f32
    %112 = vector.broadcast %cst_38 : f32 to vector<16x32xf32>
    %113 = arith.subf %112, %105 : vector<16x32xf32>
    %114 = arith.mulf %113, %110 : vector<16x32xf32>
    %115 = arith.addf %111, %114 : vector<16x32xf32>
    %116 = vector.extract_strided_slice %21 {offsets = [0, 480], sizes = [16, 64], strides = [1, 1]} : vector<16x768xf32> to vector<16x64xf32>
    %117 = vector.extract_strided_slice %21 {offsets = [0, 544], sizes = [16, 32], strides = [1, 1]} : vector<16x768xf32> to vector<16x32xf32>
    %cst_39 = arith.constant dense<0.000000e+00> : vector<16x64xf32>
    %118 = tpu.matmul %115, %22, %cst_39 {dimension_numbers = #tpu.dot_dimension_numbers<[1], [0], [0], [1], [0, 0, 1, 1], [], []>} : vector<16x32xf32>, vector<32x64xf32>, vector<16x64xf32> -> vector<16x64xf32>
    %119 = arith.addf %116, %118 : vector<16x64xf32>
    %120 = arith.negf %119 : vector<16x64xf32>
    %121 = math.exp %120 : vector<16x64xf32>
    %cst_40 = arith.constant 1.000000e+00 : f32
    %122 = vector.broadcast %cst_40 : f32 to vector<16x64xf32>
    %123 = arith.addf %122, %121 : vector<16x64xf32>
    %124 = arith.divf %122, %123 : vector<16x64xf32>
    %125 = vector.extract_strided_slice %124 {offsets = [0, 0], sizes = [16, 32], strides = [1, 1]} : vector<16x64xf32> to vector<16x32xf32>
    %126 = vector.extract_strided_slice %124 {offsets = [0, 32], sizes = [16, 32], strides = [1, 1]} : vector<16x64xf32> to vector<16x32xf32>
    %127 = arith.mulf %126, %115 : vector<16x32xf32>
    %cst_41 = arith.constant dense<0.000000e+00> : vector<16x32xf32>
    %128 = tpu.matmul %127, %23, %cst_41 {dimension_numbers = #tpu.dot_dimension_numbers<[1], [0], [0], [1], [0, 0, 1, 1], [], []>} : vector<16x32xf32>, vector<32x32xf32>, vector<16x32xf32> -> vector<16x32xf32>
    %129 = arith.addf %117, %128 : vector<16x32xf32>
    %130 = math.tanh %129 : vector<16x32xf32>
    %131 = arith.mulf %125, %115 : vector<16x32xf32>
    %cst_42 = arith.constant 1.000000e+00 : f32
    %132 = vector.broadcast %cst_42 : f32 to vector<16x32xf32>
    %133 = arith.subf %132, %125 : vector<16x32xf32>
    %134 = arith.mulf %133, %130 : vector<16x32xf32>
    %135 = arith.addf %131, %134 : vector<16x32xf32>
    %136 = vector.extract_strided_slice %21 {offsets = [0, 576], sizes = [16, 64], strides = [1, 1]} : vector<16x768xf32> to vector<16x64xf32>
    %137 = vector.extract_strided_slice %21 {offsets = [0, 640], sizes = [16, 32], strides = [1, 1]} : vector<16x768xf32> to vector<16x32xf32>
    %cst_43 = arith.constant dense<0.000000e+00> : vector<16x64xf32>
    %138 = tpu.matmul %135, %22, %cst_43 {dimension_numbers = #tpu.dot_dimension_numbers<[1], [0], [0], [1], [0, 0, 1, 1], [], []>} : vector<16x32xf32>, vector<32x64xf32>, vector<16x64xf32> -> vector<16x64xf32>
    %139 = arith.addf %136, %138 : vector<16x64xf32>
    %140 = arith.negf %139 : vector<16x64xf32>
    %141 = math.exp %140 : vector<16x64xf32>
    %cst_44 = arith.constant 1.000000e+00 : f32
    %142 = vector.broadcast %cst_44 : f32 to vector<16x64xf32>
    %143 = arith.addf %142, %141 : vector<16x64xf32>
    %144 = arith.divf %142, %143 : vector<16x64xf32>
    %145 = vector.extract_strided_slice %144 {offsets = [0, 0], sizes = [16, 32], strides = [1, 1]} : vector<16x64xf32> to vector<16x32xf32>
    %146 = vector.extract_strided_slice %144 {offsets = [0, 32], sizes = [16, 32], strides = [1, 1]} : vector<16x64xf32> to vector<16x32xf32>
    %147 = arith.mulf %146, %135 : vector<16x32xf32>
    %cst_45 = arith.constant dense<0.000000e+00> : vector<16x32xf32>
    %148 = tpu.matmul %147, %23, %cst_45 {dimension_numbers = #tpu.dot_dimension_numbers<[1], [0], [0], [1], [0, 0, 1, 1], [], []>} : vector<16x32xf32>, vector<32x32xf32>, vector<16x32xf32> -> vector<16x32xf32>
    %149 = arith.addf %137, %148 : vector<16x32xf32>
    %150 = math.tanh %149 : vector<16x32xf32>
    %151 = arith.mulf %145, %135 : vector<16x32xf32>
    %cst_46 = arith.constant 1.000000e+00 : f32
    %152 = vector.broadcast %cst_46 : f32 to vector<16x32xf32>
    %153 = arith.subf %152, %145 : vector<16x32xf32>
    %154 = arith.mulf %153, %150 : vector<16x32xf32>
    %155 = arith.addf %151, %154 : vector<16x32xf32>
    %156 = vector.extract_strided_slice %21 {offsets = [0, 672], sizes = [16, 64], strides = [1, 1]} : vector<16x768xf32> to vector<16x64xf32>
    %157 = vector.extract_strided_slice %21 {offsets = [0, 736], sizes = [16, 32], strides = [1, 1]} : vector<16x768xf32> to vector<16x32xf32>
    %cst_47 = arith.constant dense<0.000000e+00> : vector<16x64xf32>
    %158 = tpu.matmul %155, %22, %cst_47 {dimension_numbers = #tpu.dot_dimension_numbers<[1], [0], [0], [1], [0, 0, 1, 1], [], []>} : vector<16x32xf32>, vector<32x64xf32>, vector<16x64xf32> -> vector<16x64xf32>
    %159 = arith.addf %156, %158 : vector<16x64xf32>
    %160 = arith.negf %159 : vector<16x64xf32>
    %161 = math.exp %160 : vector<16x64xf32>
    %cst_48 = arith.constant 1.000000e+00 : f32
    %162 = vector.broadcast %cst_48 : f32 to vector<16x64xf32>
    %163 = arith.addf %162, %161 : vector<16x64xf32>
    %164 = arith.divf %162, %163 : vector<16x64xf32>
    %165 = vector.extract_strided_slice %164 {offsets = [0, 0], sizes = [16, 32], strides = [1, 1]} : vector<16x64xf32> to vector<16x32xf32>
    %166 = vector.extract_strided_slice %164 {offsets = [0, 32], sizes = [16, 32], strides = [1, 1]} : vector<16x64xf32> to vector<16x32xf32>
    %167 = arith.mulf %166, %155 : vector<16x32xf32>
    %cst_49 = arith.constant dense<0.000000e+00> : vector<16x32xf32>
    %168 = tpu.matmul %167, %23, %cst_49 {dimension_numbers = #tpu.dot_dimension_numbers<[1], [0], [0], [1], [0, 0, 1, 1], [], []>} : vector<16x32xf32>, vector<32x32xf32>, vector<16x32xf32> -> vector<16x32xf32>
    %169 = arith.addf %157, %168 : vector<16x32xf32>
    %170 = math.tanh %169 : vector<16x32xf32>
    %171 = arith.mulf %165, %155 : vector<16x32xf32>
    %cst_50 = arith.constant 1.000000e+00 : f32
    %172 = vector.broadcast %cst_50 : f32 to vector<16x32xf32>
    %173 = arith.subf %172, %165 : vector<16x32xf32>
    %174 = arith.mulf %173, %170 : vector<16x32xf32>
    %175 = arith.addf %171, %174 : vector<16x32xf32>
    %176 = tpu.concatenate %175, %175, %175, %175, %175, %175, %175, %175 in 1 : vector<16x32xf32>, vector<16x32xf32>, vector<16x32xf32>, vector<16x32xf32>, vector<16x32xf32>, vector<16x32xf32>, vector<16x32xf32>, vector<16x32xf32> -> vector<16x256xf32>
    %c0_51 = arith.constant 0 : index
    %c0_52 = arith.constant 0 : index
    %177 = vector.load %arg7[%c0_51, %c0_52] : memref<1x256xf32, #tpu.memory_space<vmem>>, vector<1x256xf32>
    %178 = vector.broadcast %177 : vector<1x256xf32> to vector<16x256xf32>
    %179 = arith.mulf %176, %178 : vector<16x256xf32>
    %c0_53 = arith.constant 0 : index
    %c0_54 = arith.constant 0 : index
    %180 = vector.load %arg8[%c0_53, %c0_54] : memref<1x256xf32, #tpu.memory_space<vmem>>, vector<1x256xf32>
    %181 = vector.broadcast %180 : vector<1x256xf32> to vector<16x256xf32>
    %182 = arith.addf %179, %181 : vector<16x256xf32>
    %c0_55 = arith.constant 0 : index
    %c0_56 = arith.constant 0 : index
    %c0_57 = arith.constant 0 : index
    %183 = vector.load %arg9[%c0_55, %c0_56, %c0_57] : memref<1x16x256xf32, #tpu.memory_space<vmem>>, vector<1x16x256xf32>
    %184 = vector.shape_cast %183 : vector<1x16x256xf32> to vector<16x256xf32>
    %185 = vector.shape_cast %182 : vector<16x256xf32> to vector<1x16x256xf32>
    tpu.vector_store %arg9[%c0_55, %c0_56, %c0_57], %185 {strides = array<i32>} : memref<1x16x256xf32, #tpu.memory_space<vmem>>, vector<1x16x256xf32>,
    return
  }
  func.func @transform_0(%arg0: i32) -> (i32, i32, i32) {
    %c0_i32 = arith.constant 0 : i32
    %c0_i32_0 = arith.constant 0 : i32
    %c0_i32_1 = arith.constant 0 : i32
    return %arg0, %c0_i32, %c0_i32_0 : i32, i32, i32
  }
  func.func @transform_1(%arg0: i32) -> (i32, i32, i32) {
    %c0_i32 = arith.constant 0 : i32
    %c0_i32_0 = arith.constant 0 : i32
    %c0_i32_1 = arith.constant 0 : i32
    return %arg0, %c0_i32, %c0_i32_0 : i32, i32, i32
  }
  func.func @transform_2(%arg0: i32) -> (i32, i32, i32) {
    %c0_i32 = arith.constant 0 : i32
    %c0_i32_0 = arith.constant 0 : i32
    %c0_i32_1 = arith.constant 0 : i32
    %c0_i32_2 = arith.constant 0 : i32
    return %c0_i32, %c0_i32_0, %c0_i32_1 : i32, i32, i32
  }
  func.func @transform_3(%arg0: i32) -> (i32, i32) {
    %c0_i32 = arith.constant 0 : i32
    %c0_i32_0 = arith.constant 0 : i32
    %c0_i32_1 = arith.constant 0 : i32
    return %c0_i32, %c0_i32_0 : i32, i32
  }
  func.func @transform_4(%arg0: i32) -> (i32, i32) {
    %c0_i32 = arith.constant 0 : i32
    %c0_i32_0 = arith.constant 0 : i32
    %c0_i32_1 = arith.constant 0 : i32
    return %c0_i32, %c0_i32_0 : i32, i32
  }
  func.func @transform_5(%arg0: i32) -> (i32, i32) {
    %c0_i32 = arith.constant 0 : i32
    %c0_i32_0 = arith.constant 0 : i32
    %c0_i32_1 = arith.constant 0 : i32
    return %c0_i32, %c0_i32_0 : i32, i32
  }
  func.func @transform_6(%arg0: i32) -> (i32, i32) {
    %c0_i32 = arith.constant 0 : i32
    %c0_i32_0 = arith.constant 0 : i32
    %c0_i32_1 = arith.constant 0 : i32
    return %c0_i32, %c0_i32_0 : i32, i32
  }
  func.func @transform_7(%arg0: i32) -> (i32, i32) {
    %c0_i32 = arith.constant 0 : i32
    %c0_i32_0 = arith.constant 0 : i32
    %c0_i32_1 = arith.constant 0 : i32
    return %c0_i32, %c0_i32_0 : i32, i32
  }
  func.func @transform_8(%arg0: i32) -> (i32, i32, i32) {
    %c0_i32 = arith.constant 0 : i32
    %c0_i32_0 = arith.constant 0 : i32
    %c0_i32_1 = arith.constant 0 : i32
    return %arg0, %c0_i32, %c0_i32_0 : i32, i32, i32
  }
}

</mosaic_0001>

<bundles_post_ra>
// kernel: tpu_custom_call.1
= control target key start
LH: loop header
LB: loop body
LE: loop exit
PB: predicated region body
PF: predicated region fallthrough
CT: control target
= control target key end

     0   :  { %13 = vsyncpa [#allocation3], 0  ;;  %s3217_s0 = inlined_call_operand.vmem [shape: f32[2,16,32], index: 0, kind: input, shape index: {}]   ;;  %s3218_s1 = inlined_call_operand.vmem [shape: f32[2,48,16], index: 1, kind: input, shape index: {}]   ;;  %s3219_s2 = inlined_call_operand.hbm [shape: f32[3,32,768], index: 2, kind: input, shape index: {}]   ;;  %s3220_s3 = inlined_call_operand.vmem [shape: f32[1,768], index: 3, kind: input, shape index: {}]   ;;  %s3221_s4 = inlined_call_operand.vmem [shape: f32[32,64], index: 4, kind: input, shape index: {}]   ;;  %s3222_s5 = inlined_call_operand.vmem [shape: f32[32,32], index: 5, kind: input, shape index: {}]   ;;  %s3223_s6 = inlined_call_operand.vmem [shape: f32[1,256], index: 6, kind: input, shape index: {}]   ;;  %s3224_s7 = inlined_call_operand.vmem [shape: f32[1,256], index: 7, kind: input, shape index: {}]   ;;  %s3225_s8 = inlined_call_operand.hbm [shape: f32[2,16,256], index: 8, kind: output, shape index: {}]  }
   0x1   :  { %14 = vsyncpa [#allocation4], 0 }
   0x2   :  { %16 = vsyncpa [#allocation4 + $0x1], 0  ;;  %s2680_s27 = smov 0   ;;  %s2682_s28 = smov 0  }
   0x3   :  { %s2684_s29 = smov 0   ;;  %s2686_s30 = smov 0  }
   0x4 LB: > { %s2701_s9 = sadd.s32 4294967295, %s2625_s30   ;;  %s2248_s10 = sadd.s32 4294967294, %s2625_s30   ;;  %s2625_s30 = sphi %s2686_s30, %s3231_s30   ;;  %s2621_s29 = sphi %s2684_s29, %s3230_s29   ;;  %s2617_s28 = sphi %s2682_s28, %s3229_s28   ;;  %s2613_s27 = sphi %s2680_s27, %s3228_s27  }
   0x5   : > { %s2705_s11 = sadd.s32 1, %s2625_s30   ;;  %s207_s12 = sadd.s32 1, %s2621_s29 }
   0x6   : > { %s204_s13 = ssub.s32 %s2625_s30, %s2705_s11  ;;  %p217_p0 = scmp.ne.s32.totalorder %s2621_s29, %s2617_s28 }
   0x7   : > { %p205_p1 = scmp.eq.s32.totalorder %s204_s13, 0  ;;  %p218_p2 = scmp.eq.s32.totalorder %s2701_s9, 1 }
   0x8   : > { %p223_p3 = scmp.ne.s32.totalorder %s2617_s28, %s2613_s27  ;;  %p224_p4 = scmp.eq.s32.totalorder %s2248_s10, 1 }
   0x9   : > { %s2716_s14 = scalar_select %p205_p1, %s2621_s29, %s207_s12  }
   0xa   : > { %p2718_p5 = por %p218_p2, %p217_p0  ;;  %p2722_p6 = por %p224_p4, %p223_p3 }
   0xb   : > { %p2249_p7 = scmp.ge.s32.totalorder %s2625_s30, 1  ;;  %p231_p8 = scmp.lt.s32.totalorder %s2625_s30, 3 }
   0xc   : > { %p2374_p9 = scmp.eq.s32.totalorder %s2701_s9, 0  ;;  %s242_s19 = sshll.u32 %s3219_s2, 4  ;;  %s243_s19 = int_to_ptr.hbm [resolvable:$true] %s242_s19 }
   0xd   : > { %p232_p10 = pnand %p2249_p7, %p231_p8  ;;  %s2627_s20 = smov [#allocation2]  }
   0xe   : > { %s244_s21 = sshll.u32 %s2627_s20, 4  ;;  %s2628_s22 = smov 768   ;;  %s245_s21 = int_to_ptr.vmem [resolvable:$true] %s244_s21 }
   0xf   : > { %p2366_p11 = pneg %p232_p10  ;;  %s2629_s23 = smov 48  }
  0x10   : > { %291 = sbr.rel (%p232_p10) target bundleno = 5781 (0x1695), region = 52 }
  0x11   : > { %p2367_p12 = pnand %p2374_p9, %p2366_p11 }
  0x13   : > { %2369 = dma.hbm_to_vmem [thread:$0]  (!%p2367_p12), %s243_s19, 9216, %s245_s21, [#allocation3], %s2628_s22, %s2628_s22, %s2629_s23  }
  0x15   : > { %2604 = dma.done.wait (%p2374_p9), [#allocation3], 9216  }
  0x16   : > { %2606 = vsyncadd (%p2374_p9), [#allocation3], 4294958080  ;;  %p331_p13 = scmp.lt.s32.totalorder %s2701_s9, 1  ;;  %vm349_vm0 = vcmask 130048   ;;  %v424_v4 = vld [vmem:[#allocation2 + $0xa8] sm:$0xff]  ;;  %v418_v5 = vld [vmem:[#allocation2 + $0x78] sm:$0xff] }
  0x17   : > { %v412_v6 = vld [vmem:[#allocation2 + $0x48] sm:$0xff]  ;;  %v406_v11 = vld [vmem:[#allocation2 + $0x18] sm:$0xff]  ;;  %v446_v12 = vld [vmem:[#allocation2 + $0x150] sm:$0xff]  ;;  %vm452_vm1 = vcmask 261120   ;;  %s2630_s17 = smov 64   ;;  %s2631_s18 = smov 96  }
  0x18   : > { %s332_s24 = scalar_select %p331_p13, %s2701_s9, 1  ;;  %v447_v13 = vld [vmem:[#allocation2 + $0x158] sm:$0xff]  ;;  %v440_v14 = vld [vmem:[#allocation2 + $0x120] sm:$0xff]  ;;  %471 = vmatpush.msra.mxu1 %v446_v12  ;;  %v441_v15 = vld [vmem:[#allocation2 + $0x128] sm:$0xff]  ;;  %2355 = vmatpush.msra.mxu3 %v446_v12 }
  0x19   : > { %494 = vmatpush.msra.mxu2 %v447_v13  ;;  %v434_v16 = vld [vmem:[#allocation2 + $0xf0] sm:$0xff]  ;;  %v435_v17 = vld [vmem:[#allocation2 + $0xf8] sm:$0xff]  ;;  %v428_v18 = vld [vmem:[#allocation2 + $0xc0] sm:$0xff]  ;;  %s2632_s10 = smov 32   ;;  %s2354_s22 = sshll.u32 %s2701_s9, 5 }
  0x1a   : > { %s2353_s25 = sshll.u32 %s332_s24, 4  ;;  %s2359_s26 = smul.u32 48, %s332_s24  ;;  %472 = vmatpush.msra.mxu1 %v440_v14  ;;  %2356 = vmatpush.msra.mxu3 %v440_v14  ;;  %v429_v19 = vld [vmem:[#allocation2 + $0xc8] sm:$0xff]  ;;  %v443_v21 = vld [vmem:[#allocation2 + $0x138] sm:$0xff]  ;;  %v448_v24 = vld [vmem:[#allocation2 + $0x160] sm:$0xff] }
  0x1b   : > { %s335_s13 = scalar_lea.vmem %s3217_s0, %s2353_s25  ;;  %495 = vmatpush.msra.mxu2 %v441_v15  ;;  %v449_v20 = vld [vmem:[#allocation2 + $0x168] sm:$0xff]  ;;  %v431_v23 = vld [vmem:[#allocation2 + $0xd8] sm:$0xff]  ;;  %v450_v25 = vld [vmem:[#allocation2 + $0x170] sm:$0xff]  ;;  %s2158_s25 = scalar_lea.hbm %s3225_s8, %s2354_s22 }
  0x1c   : > { %s340_s19 = scalar_lea.vmem %s3218_s1, %s2359_s26  ;;  %v342_v0 = vld [vmem:[%s335_s13 + $0x8] sm:$0xff]  ;;  %v341_v1 = vld [vmem:[%s335_s13] sm:$0xff]  ;;  %473 = vmatpush.msra.mxu1 %v434_v16  ;;  %2357 = vmatpush.msra.mxu3 %v434_v16  ;;  %v442_v26 = vld [vmem:[#allocation2 + $0x130] sm:$0xff] }
  0x1d   : > { %382 = vmatpush.msra.mxu0 %v342_v0  ;;  %v343_v2 = vld [vmem:[%s340_s19] sm:$0xff]  ;;  %v344_v3 = vld [vmem:[%s340_s19 + $0x8] sm:$0xff]  ;;  %v345_v7 = vld [vmem:[%s340_s19 + $0x10] sm:$0xff]  ;;  %496 = vmatpush.msra.mxu2 %v435_v17 }
  0x1e   : > { %v346_v8 = vld [vmem:[%s340_s19 + $0x18] sm:$0xff]  ;;  %v347_v9 = vld [vmem:[%s340_s19 + $0x20] sm:$0xff]  ;;  %v348_v10 = vld [vmem:[%s340_s19 + $0x28] sm:$0xff]  ;;  %474 = vmatpush.msra.mxu1 %v428_v18  ;;  %2358 = vmatpush.msra.mxu3 %v428_v18  ;;  %s328_s19 = sand.u32 1, %s2617_s28  }
  0x1f   : > { %383 = vmatpush.msra.mxu0 %v341_v1  ;;  %497 = vmatpush.msra.mxu2 %v429_v19  ;;  %v437_v22 = vld [vmem:[#allocation2 + $0x108] sm:$0xff]  ;;  %v444_v27 = vld [vmem:[#allocation2 + $0x140] sm:$0xff]  ;;  %v438_v29 = vld [vmem:[#allocation2 + $0x110] sm:$0xff]  ;;  %s2147_s9 = scalar_lea.sflag [#allocation4], %s328_s19 }
  0x20   : > { %2258 = vmatmul.msk.f32.vlgmr.msra.gmra.mxu0 %vm349_vm0, %v343_v2  ;;  %540 = vmatpush.msrb.mxu1 %v449_v20  ;;  %v436_v28 = vld [vmem:[#allocation2 + $0x100] sm:$0xff]  ;;  %v430_v30 = vld [vmem:[#allocation2 + $0xd0] sm:$0xff]  ;;  %v422_v35 = vld [vmem:[#allocation2 + $0x98] sm:$0xff] }
  0x21   : > { %684 = vmatpush.msrb.mxu0 %v424_v4  ;;  %517 = vmatpush.msrb.mxu3 %v448_v24  ;;  %v432_v31 = vld [vmem:[#allocation2 + $0xe0] sm:$0xff]  ;;  %v421_v34 = vld [vmem:[#allocation2 + $0x90] sm:$0xff]  ;;  %v416_v38 = vld [vmem:[#allocation2 + $0x68] sm:$0xff] }
  0x22   : > { %541 = vmatpush.msrb.mxu1 %v443_v21  ;;  %563 = vmatpush.msrb.mxu2 %v450_v25  ;;  %v415_v37 = vld [vmem:[#allocation2 + $0x60] sm:$0xff]  ;;  %v761_v39 = vld [vmem:[#allocation2 + $0x218] sm:$0xff]  ;;  %v409_v40 = vld [vmem:[#allocation2 + $0x30] sm:$0xff] }
  0x23   : > { %685 = vmatpush.msrb.mxu0 %v418_v5  ;;  %518 = vmatpush.msrb.mxu3 %v442_v26  ;;  %v410_v41 = vld [vmem:[#allocation2 + $0x38] sm:$0xff]  ;;  %v755_v42 = vld [vmem:[#allocation2 + $0x1e8] sm:$0xff]  ;;  %v403_v44 = vld [vmem:[#allocation2] sm:$0xff] }
  0x24   : > { %542 = vmatpush.msrb.mxu1 %v437_v22  ;;  %564 = vmatpush.msrb.mxu2 %v444_v27  ;;  %v749_v43 = vld [vmem:[#allocation2 + $0x1b8] sm:$0xff]  ;;  %v404_v45 = vld [vmem:[#allocation2 + $0x8] sm:$0xff]  ;;  %v425_v48 = vld [vmem:[#allocation2 + $0xb0] sm:$0xff] }
  0x25   : > { %686 = vmatpush.msrb.mxu0 %v412_v6  ;;  %519 = vmatpush.msrb.mxu3 %v436_v28  ;;  %v451_v46 = vld [vmem:[#allocation2 + $0x178] sm:$0xff]  ;;  %v743_v49 = vld [vmem:[#allocation2 + $0x188] sm:$0xff]  ;;  %v419_v51 = vld [vmem:[#allocation2 + $0x80] sm:$0xff] }
  0x26   : > { %543 = vmatpush.msrb.mxu1 %v431_v23  ;;  %565 = vmatpush.msrb.mxu2 %v438_v29  ;;  %v445_v50 = vld [vmem:[#allocation2 + $0x148] sm:$0xff]  ;;  %v439_v52 = vld [vmem:[#allocation2 + $0x118] sm:$0xff]  ;;  %v413_v53 = vld [vmem:[#allocation2 + $0x50] sm:$0xff] }
  0x27   : > { %687 = vmatpush.msrb.mxu0 %v406_v11  ;;  %520 = vmatpush.msrb.mxu3 %v430_v30  ;;  %v433_v54 = vld [vmem:[#allocation2 + $0xe8] sm:$0xff]  ;;  %v423_v55 = vld [vmem:[#allocation2 + $0xa0] sm:$0xff]  ;;  %v417_v58 = vld [vmem:[#allocation2 + $0x70] sm:$0xff] }
  0x28   : > { %2259 = vmatmul.msk.f32.gmra.mxu0 %vm349_vm0, %v344_v3  ;;  %566 = vmatpush.msrb.mxu2 %v432_v31  ;;  %v407_v57 = vld [vmem:[#allocation2 + $0x20] sm:$0xff]  ;;  %v426_v59 = vld [vmem:[#allocation2 + $0xb8] sm:$0xff]  ;;  %v420_v62 = vld [vmem:[#allocation2 + $0x88] sm:$0xff] }
  0x29   : > { %807 = vmatpush.msra.mxu0 %v761_v39  ;;  %v765_v60 = vld [vmem:[#allocation2 + $0x238] sm:$0xff]  ;;  %v411_v61 = vld [vmem:[#allocation2 + $0x40] sm:$0xff]  ;;  %v759_v63 = vld [vmem:[#allocation2 + $0x208] sm:$0xff] }
  0x2a   : > { %v405_v0 = vld [vmem:[#allocation2 + $0x10] sm:$0xff]  ;;  %v414_v1 = vld [vmem:[#allocation2 + $0x58] sm:$0xff]  ;;  %v408_v2 = vld [vmem:[#allocation2 + $0x28] sm:$0xff] }
  0x2b   : > { %808 = vmatpush.msra.mxu0 %v755_v42  ;;  %v762_v4 = vld [vmem:[#allocation2 + $0x220] sm:$0xff]  ;;  %v753_v5 = vld [vmem:[#allocation2 + $0x1d8] sm:$0xff]  ;;  %v756_v6 = vld [vmem:[#allocation2 + $0x1f0] sm:$0xff] }
  0x2c   : > { %v754_v11 = vld [vmem:[#allocation2 + $0x1e0] sm:$0xff]  ;;  %v763_v12 = vld [vmem:[#allocation2 + $0x228] sm:$0xff]  ;;  %v748_v13 = vld [vmem:[#allocation2 + $0x1b0] sm:$0xff] }
  0x2d   : > { %809 = vmatpush.msra.mxu0 %v749_v43  ;;  %v757_v14 = vld [vmem:[#allocation2 + $0x1f8] sm:$0xff]  ;;  %v742_v15 = vld [vmem:[#allocation2 + $0x180] sm:$0xff]  ;;  %v751_v16 = vld [vmem:[#allocation2 + $0x1c8] sm:$0xff] }
  0x2e   : > { %v745_v17 = vld [vmem:[#allocation2 + $0x198] sm:$0xff]  ;;  %v764_v18 = vld [vmem:[#allocation2 + $0x230] sm:$0xff]  ;;  %v758_v19 = vld [vmem:[#allocation2 + $0x200] sm:$0xff] }
  0x2f   : > { %810 = vmatpush.msra.mxu0 %v743_v49  ;;  %v752_v20 = vld [vmem:[#allocation2 + $0x1d0] sm:$0xff]  ;;  %v746_v21 = vld [vmem:[#allocation2 + $0x1a0] sm:$0xff] }
  0x30   : > { %2260 = vmatmul.msk.f32.gmra.mxu0 %vm349_vm0, %v345_v7  ;;  %v747_v7 = vld [vmem:[#allocation2 + $0x1a8] sm:$0xff]  ;;  %v2851_v49 = vld [vmem:[%s3220_s3] sm:$0x3f] }
  0x38   : > { %2261 = vmatmul.msk.f32.gmra.mxu0 %vm349_vm0, %v346_v8  ;;  %v750_v8 = vld [vmem:[#allocation2 + $0x1c0] sm:$0xff] }
  0x40   : > { %2262 = vmatmul.msk.f32.gmra.mxu0 %vm349_vm0, %v347_v9  ;;  %v760_v9 = vld [vmem:[#allocation2 + $0x210] sm:$0xff] }
  0x48   : > { %2263 = vmatmul.msk.f32.gmra.mxu0 %vm349_vm0, %v348_v10  ;;  %v744_v10 = vld [vmem:[#allocation2 + $0x190] sm:$0xff] }
  0x9d   : > { %v2752_v32 = vpop.f32.mrf.mxu0 }
  0x9e   : > { %2282 = vmatmul.msk.f32.vlgmr.msrb.gmra.mxu0 %vm452_vm1, %v2752_v32 }
  0x9f   : > { %899 = vmatpush.msrb.mxu0 %v765_v60 }
  0xa1   : > { %900 = vmatpush.msrb.mxu0 %v759_v63 }
  0xa3   : > { %901 = vmatpush.msrb.mxu0 %v753_v5  ;;  %v2867_v5 = vld [vmem:[%s3221_s4 + $0x10] sm:$0xff] }
  0xa5   : > { %v2756_v33 = vpop.f32.mrf.mxu0  ;;  %902 = vmatpush.msrb.mxu0 %v747_v7 }
  0xa6   : > { %2283 = vmatmul.msk.f32.gmra.mxu0 %vm452_vm1, %v2756_v33 }
  0xad   : > { %v2760_v36 = vpop.f32.mrf.mxu0 }
  0xae   : > { %2264 = vmatmul.msk.f32.vlgmr.msra.gmra.mxu1 %vm452_vm1, %v2760_v36  ;;  %2266 = vmatmul.msk.f32.vlgmr.msra.gmra.mxu2 %vm452_vm1, %v2760_v36 }
  0xaf   : > { %615 = vmatpush.msra.mxu1 %v421_v34  ;;  %638 = vmatpush.msra.mxu2 %v422_v35 }
  0xb1   : > { %616 = vmatpush.msra.mxu1 %v415_v37  ;;  %639 = vmatpush.msra.mxu2 %v416_v38 }
  0xb3   : > { %617 = vmatpush.msra.mxu1 %v409_v40  ;;  %640 = vmatpush.msra.mxu2 %v410_v41 }
  0xb5   : > { %v2766_v47 = vpop.f32.mrf.mxu0  ;;  %618 = vmatpush.msra.mxu1 %v403_v44  ;;  %641 = vmatpush.msra.mxu2 %v404_v45 }
  0xb6   : > { %2265 = vmatmul.msk.f32.vlgmr.msra.gmra.mxu3 %vm452_vm1, %v2766_v47  ;;  %2267 = vmatmul.msk.f32.gmra.mxu2 %vm452_vm1, %v2766_v47 }
  0xb7   : > { %2270 = vmatmul.msk.f32.vlgmr.msrb.gmra.mxu1 %vm452_vm1, %v2760_v36  ;;  %586 = vmatpush.msra.mxu3 %v451_v46 }
  0xb8   : > { %707 = vmatpush.msrb.mxu1 %v425_v48 }
  0xb9   : > { %587 = vmatpush.msra.mxu3 %v445_v50 }
  0xba   : > { %708 = vmatpush.msrb.mxu1 %v419_v51 }
  0xbb   : > { %588 = vmatpush.msra.mxu3 %v439_v52 }
  0xbc   : > { %709 = vmatpush.msrb.mxu1 %v413_v53 }
  0xbd   : > { %589 = vmatpush.msra.mxu3 %v433_v54  ;;  %v2774_v56 = vpop.f32.mrf.mxu0  ;;  %v929_v54 = vperm.slane %v2851_v49, 5 }
  0xbe   : > { %2268 = vmatmul.msk.f32.vlgmr.msrb.gmra.mxu3 %vm452_vm1, %v2760_v36  ;;  %2272 = vmatmul.msk.f32.vlgmr.msrb.gmra.mxu2 %vm452_vm1, %v2760_v36 }
  0xbf   : > { %2271 = vmatmul.msk.f32.gmra.mxu1 %vm452_vm1, %v2766_v47  ;;  %661 = vmatpush.msrb.mxu3 %v423_v55  ;;  %v926_v55 = vperm.slane %v2851_v49, 2 }
  0xc0   : > { %710 = vmatpush.msrb.mxu1 %v407_v57  ;;  %2290 = vmatmul.msk.f32.vlgmr.msra.gmra.mxu0 %vm452_vm1, %v2774_v56 }
  0xc1   : > { %662 = vmatpush.msrb.mxu3 %v417_v58  ;;  %730 = vmatpush.msrb.mxu2 %v426_v59 }
  0xc3   : > { %663 = vmatpush.msrb.mxu3 %v411_v61  ;;  %731 = vmatpush.msrb.mxu2 %v420_v62 }
  0xc5   : > { %664 = vmatpush.msrb.mxu3 %v405_v0  ;;  %732 = vmatpush.msrb.mxu2 %v414_v1  ;;  %v400_v3 = vpop.f32.mrf.mxu0 }
  0xc6   : > { %2269 = vmatmul.msk.f32.gmra.mxu3 %vm452_vm1, %v2766_v47  ;;  %2273 = vmatmul.msk.f32.gmra.mxu2 %vm452_vm1, %v2766_v47 }
  0xc7   : > { %2276 = vmatmul.msk.f32.vlgmr.msra.gmra.mxu1 %vm452_vm1, %v2752_v32  ;;  %733 = vmatpush.msrb.mxu2 %v408_v2 }
  0xc8   : > { %2291 = vmatmul.msk.f32.gmra.mxu0 %vm452_vm1, %v400_v3  ;;  %830 = vmatpush.msra.mxu1 %v762_v4  ;;  %v2862_v4 = vld [vmem:[%s3221_s4 + $0x18] sm:$0xff] }
  0xca   : > { %831 = vmatpush.msra.mxu1 %v756_v6 }
  0xcc   : > { %832 = vmatpush.msra.mxu1 %v750_v8  ;;  %v2876_v8 = vld [vmem:[%s3221_s4 + $0x8] sm:$0xff] }
  0xce   : > { %2274 = vmatmul.msk.f32.vlgmr.msra.gmra.mxu3 %vm452_vm1, %v2760_v36  ;;  %2278 = vmatmul.msk.f32.vlgmr.msra.gmra.mxu2 %vm452_vm1, %v2752_v32 }
  0xcf   : > { %2277 = vmatmul.msk.f32.gmra.mxu1 %vm452_vm1, %v2756_v33  ;;  %784 = vmatpush.msra.mxu3 %v760_v9 }
  0xd0   : > { %833 = vmatpush.msra.mxu1 %v744_v10  ;;  %2298 = vmatmul.msk.f32.vlgmr.msrb.gmra.mxu0 %vm452_vm1, %v2774_v56 }
  0xd1   : > { %785 = vmatpush.msra.mxu3 %v754_v11  ;;  %853 = vmatpush.msra.mxu2 %v763_v12  ;;  %v924_v11 = vperm.slane %v2851_v49, 0  ;;  %v927_v12 = vperm.slane %v2851_v49, 3 }
  0xd3   : > { %786 = vmatpush.msra.mxu3 %v748_v13  ;;  %854 = vmatpush.msra.mxu2 %v757_v14  ;;  %v2887_v13 = vld [vmem:[%s3221_s4] sm:$0xff] }
  0xd5   : > { %787 = vmatpush.msra.mxu3 %v742_v15  ;;  %855 = vmatpush.msra.mxu2 %v751_v16 }
  0xd6   : > { %2275 = vmatmul.msk.f32.gmra.mxu3 %vm452_vm1, %v2766_v47  ;;  %2279 = vmatmul.msk.f32.gmra.mxu2 %vm452_vm1, %v2756_v33 }
  0xd7   : > { %2284 = vmatmul.msk.f32.vlgmr.msrb.gmra.mxu1 %vm452_vm1, %v2752_v32  ;;  %856 = vmatpush.msra.mxu2 %v745_v17 }
  0xd8   : > { %2299 = vmatmul.msk.f32.gmra.mxu0 %vm452_vm1, %v400_v3  ;;  %1026 = vmatpush.msrb.mxu1 %v2862_v4 }
  0xda   : > { %1027 = vmatpush.msrb.mxu1 %v2867_v5 }
  0xdc   : > { %1028 = vmatpush.msrb.mxu1 %v2876_v8 }
  0xde   : > { %2280 = vmatmul.msk.f32.vlgmr.msrb.gmra.mxu3 %vm452_vm1, %v2752_v32  ;;  %2286 = vmatmul.msk.f32.vlgmr.msrb.gmra.mxu2 %vm452_vm1, %v2752_v32 }
  0xdf   : > { %2285 = vmatmul.msk.f32.gmra.mxu1 %vm452_vm1, %v2756_v33  ;;  %876 = vmatpush.msrb.mxu3 %v764_v18 }
  0xe0   : > { %1029 = vmatpush.msrb.mxu1 %v2887_v13 }
  0xe1   : > { %877 = vmatpush.msrb.mxu3 %v758_v19 }
  0xe3   : > { %878 = vmatpush.msrb.mxu3 %v752_v20 }
  0xe5   : > { %879 = vmatpush.msrb.mxu3 %v746_v21 }
  0xe6   : > { %2281 = vmatmul.msk.f32.gmra.mxu3 %vm452_vm1, %v2756_v33  ;;  %2287 = vmatmul.msk.f32.gmra.mxu2 %vm452_vm1, %v2756_v33 }
  0xe7   : > { %2292 = vmatmul.msk.f32.vlgmr.msra.gmra.mxu1 %vm452_vm1, %v2774_v56 }
  0xe8   : > { %1354 = vmatpush.msra.mxu1 %v2862_v4 }
  0xea   : > { %1355 = vmatpush.msra.mxu1 %v2867_v5 }
  0xec   : > { %1356 = vmatpush.msra.mxu1 %v2876_v8 }
  0xee   : > { %2288 = vmatmul.msk.f32.vlgmr.msra.gmra.mxu3 %vm452_vm1, %v2774_v56  ;;  %2294 = vmatmul.msk.f32.vlgmr.msra.gmra.mxu2 %vm452_vm1, %v2774_v56 }
  0xef   : > { %2293 = vmatmul.msk.f32.gmra.mxu1 %vm452_vm1, %v400_v3  ;;  %1212 = vmatpush.msra.mxu3 %v2862_v4 }
  0xf0   : > { %1357 = vmatpush.msra.mxu1 %v2887_v13 }
  0xf1   : > { %1213 = vmatpush.msra.mxu3 %v2867_v5 }
  0xf3   : > { %1214 = vmatpush.msra.mxu3 %v2876_v8 }
  0xf5   : > { %1215 = vmatpush.msra.mxu3 %v2887_v13 }
  0xf6   : > { %2289 = vmatmul.msk.f32.gmra.mxu3 %vm452_vm1, %v400_v3  ;;  %2295 = vmatmul.msk.f32.gmra.mxu2 %vm452_vm1, %v400_v3 }
  0xfe   : > { %2296 = vmatmul.msk.f32.vlgmr.msrb.gmra.mxu3 %vm452_vm1, %v2774_v56 }
  0xff   : > { %1504 = vmatpush.msrb.mxu3 %v2862_v4 }
 0x101   : > { %1505 = vmatpush.msrb.mxu3 %v2867_v5 }
 0x103   : > { %1506 = vmatpush.msrb.mxu3 %v2876_v8 }
 0x105   : > { %1507 = vmatpush.msrb.mxu3 %v2887_v13 }
 0x106   : > { %2297 = vmatmul.msk.f32.gmra.mxu3 %vm452_vm1, %v400_v3 }
 0x11b   : > { %v689_v24 = vpop.f32.mrf.mxu0 }
 0x123   : > { %v692_v29 = vpop.f32.mrf.mxu0 }
 0x12b   : > { %v476_v22 = vpop.f32.mrf.mxu1 }
 0x131   : > { %v2828_v23 = vpop.f32.mrf.mxu2 }
 0x134   : > { %v545_v25 = vpop.f32.mrf.mxu1 }
 0x135   : > { %v690_v26 = vadd.f32 %v689_v24, %v545_v25 }
 0x139   : > { %v2830_v27 = vpop.f32.mrf.mxu3  ;;  %v2832_v28 = vpop.f32.mrf.mxu2 }
 0x13c   : > { %v548_v30 = vpop.f32.mrf.mxu1 }
 0x13d   : > { %v2834_v31 = vadd.f32 %v692_v29, %v548_v30  ;;  %v2836_v37 = vpop.f32.mrf.mxu0 }
 0x141   : > { %v522_v32 = vpop.f32.mrf.mxu3  ;;  %v568_v33 = vpop.f32.mrf.mxu2 }
 0x144   : > { %v620_v34 = vpop.f32.mrf.mxu1 }
 0x145   : > { %v2840_v42 = vpop.f32.mrf.mxu0  ;;  %v621_v10 = vadd.f32 %v620_v34, %v476_v22 }
 0x149   : > { %v525_v35 = vpop.f32.mrf.mxu3  ;;  %v571_v36 = vpop.f32.mrf.mxu2 }
 0x14c   : > { %v623_v38 = vpop.f32.mrf.mxu1 }
 0x14d   : > { %v904_v48 = vpop.f32.mrf.mxu0  ;;  %v624_v20 = vadd.f32 %v623_v38, %v2830_v27  ;;  %v928_v27 = vperm.slane %v2851_v49, 4 }
 0x151   : > { %v591_v39 = vpop.f32.mrf.mxu3  ;;  %v2838_v40 = vpop.f32.mrf.mxu2 }
 0x154   : > { %v712_v41 = vpop.f32.mrf.mxu1 }
 0x155   : > { %v2842_v43 = vadd.f32 %v712_v41, %v568_v33  ;;  %v907_v61 = vpop.f32.mrf.mxu0 }
 0x159   : > { %v594_v44 = vpop.f32.mrf.mxu3  ;;  %v2844_v45 = vpop.f32.mrf.mxu2 }
 0x15c   : > { %v715_v46 = vpop.f32.mrf.mxu1 }
 0x15d   : > { %v2846_v47 = vadd.f32 %v715_v46, %v571_v36 }
 0x161   : > { %v666_v50 = vpop.f32.mrf.mxu3  ;;  %v735_v51 = vpop.f32.mrf.mxu2 }
 0x162   : > { %v667_v52 = vadd.f32 %v666_v50, %v522_v32  ;;  %v736_v53 = vadd.f32 %v735_v51, %v591_v39 }
 0x164   : > { %v835_v56 = vpop.f32.mrf.mxu1  ;;  %v915_v57 = vadd.f32 %v904_v48, %v736_v53 }
 0x165   : > { %v912_v58 = vadd.f32 %v835_v56, %v667_v52 }
 0x166   : > { %v2855_v59 = vadd.f32 %v929_v54, %v915_v57 }
 0x167   : > { %v2857_v60 = vadd.f32 %v926_v55, %v912_v58 }
 0x169   : > { %v669_v62 = vpop.f32.mrf.mxu3  ;;  %v738_v63 = vpop.f32.mrf.mxu2 }
 0x16a   : > { %v670_v0 = vadd.f32 %v669_v62, %v525_v35  ;;  %v739_v1 = vadd.f32 %v738_v63, %v594_v44 }
 0x16c   : > { %v838_v2 = vpop.f32.mrf.mxu1  ;;  %v921_v3 = vadd.f32 %v907_v61, %v739_v1 }
 0x16d   : > { %v918_v6 = vadd.f32 %v838_v2, %v670_v0 }
 0x16e   : > { %v2871_v7 = vadd.f32 %v929_v54, %v921_v3 }
 0x16f   : > { %v2878_v9 = vadd.f32 %v926_v55, %v918_v6 }
 0x171   : > { %v789_v14 = vpop.f32.mrf.mxu3  ;;  %v858_v15 = vpop.f32.mrf.mxu2 }
 0x172   : > { %v910_v16 = vadd.f32 %v789_v14, %v621_v10  ;;  %v913_v17 = vadd.f32 %v858_v15, %v690_v26 }
 0x174   : > { %v2893_v18 = vadd.f32 %v924_v11, %v910_v16  ;;  %v2895_v19 = vadd.f32 %v927_v12, %v913_v17 }
 0x176   : > { %2417 = vtanh.f32 %v2893_v18  ;;  %v2300_v39 = vmul.f32 -1.442695, %v2893_v18 }
 0x179   : > { %v792_v21 = vpop.f32.mrf.mxu3  ;;  %v861_v22 = vpop.f32.mrf.mxu2 }
 0x17a   : > { %v916_v24 = vadd.f32 %v792_v21, %v624_v20  ;;  %v919_v25 = vadd.f32 %v861_v22, %v2834_v31 }
 0x17c   : > { %v2418_v26 = vpop.eup %2417  ;;  %v2908_v29 = vadd.f32 %v924_v11, %v916_v24  ;;  %v2910_v30 = vadd.f32 %v927_v12, %v919_v25  ;;  %v644_v24 = vadd.f32 %v2838_v40, %v2828_v23  ;;  %v2945_v25 = vld [vmem:[%s3222_s5 + $0x18] sm:$0xff]  ;;  %v2959_v23 = vld [vmem:[%s3222_s5 + $0x8] sm:$0xff]  ;;  %v2966_v40 = vld [vmem:[%s3222_s5] sm:$0xff] }
 0x17d   : > { %1000 = vrot.lane.b32.xlu0 %v2418_v26, %s2630_s17  ;;  %v2950_v26 = vld [vmem:[%s3222_s5 + $0x10] sm:$0xff]  ;;  %1145 = vmatpush.msrb.mxu2 %v2945_v25 }
 0x17e   : > { %2419 = vtanh.f32 %v2908_v29  ;;  %v2301_v41 = vmul.f32 -1.442695, %v2908_v29  ;;  %1295 = vmatpush.msra.mxu0 %v2945_v25 }
 0x17f   : > { %2421 = vpow2.f32 %v2300_v39  ;;  %1146 = vmatpush.msrb.mxu2 %v2950_v26 }
 0x180   : > { %2423 = vpow2.f32 %v2301_v41  ;;  %1296 = vmatpush.msra.mxu0 %v2950_v26 }
 0x181   : > { %v881_v32 = vpop.f32.mrf.mxu3  ;;  %1147 = vmatpush.msrb.mxu2 %v2959_v23 }
 0x182   : > { %v914_v33 = vadd.f32 %v881_v32, %v2842_v43  ;;  %v925_v32 = vperm.slane %v2851_v49, 1  ;;  %v647_v49 = vadd.f32 %v2844_v45, %v2832_v28  ;;  %1297 = vmatpush.msra.mxu0 %v2959_v23 }
 0x183   : > { %1148 = vmatpush.msrb.mxu2 %v2966_v40 }
 0x184   : > { %v2420_v31 = vpop.eup %2419  ;;  %v2916_v34 = vadd.f32 %v928_v27, %v914_v33  ;;  %1298 = vmatpush.msra.mxu0 %v2966_v40 }
 0x185   : > { %1002 = vrot.lane.b32.xlu0 %v2420_v31, %s2630_s17  ;;  %v2422_v44 = vpop.eup %2421  ;;  %1437 = vmatpush.msra.mxu2 %v2945_v25 }
 0x186   : > { %v962_v46 = vadd.f32 1.0, %v2422_v44  ;;  %v2424_v43 = vpop.eup %2423  ;;  %1579 = vmatpush.msrb.mxu0 %v2945_v25 }
 0x187   : > { %v963_v48 = vadd.f32 1.0, %v2424_v43  ;;  %1438 = vmatpush.msra.mxu2 %v2950_v26 }
 0x188   : > { %2425 = vrcp.f32 %v962_v46  ;;  %v975_v57 = vand.u32 2147483648, %v962_v46  ;;  %vm969_vm3 = vweird.f32 %v962_v46  ;;  %v973_v58 = vand.u32 2147483647, %v962_v46  ;;  %1580 = vmatpush.msrb.mxu0 %v2950_v26 }
 0x189   : > { %v884_v35 = vpop.f32.mrf.mxu3  ;;  %2427 = vrcp.f32 %v963_v48  ;;  %v990_v2 = vand.u32 2147483648, %v963_v48  ;;  %vm984_vm7 = vweird.f32 %v963_v48  ;;  %v988_v6 = vand.u32 2147483647, %v963_v48  ;;  %1439 = vmatpush.msra.mxu2 %v2959_v23 }
 0x18a   : > { %v920_v36 = vadd.f32 %v884_v35, %v2846_v47  ;;  %v976_v63 = vor.u32 1.1754944e-38, %v975_v57  ;;  %vm974_vm5 = vcmp.eq.f32.partialorder %v973_v58, 8.507059e+37  ;;  %v917_v35 = vadd.f32 %v2840_v42, %v647_v49  ;;  %1581 = vmatpush.msrb.mxu0 %v2959_v23 }
 0x18b   : > { %v991_v14 = vor.u32 1.1754944e-38, %v990_v2  ;;  %vm989_vm9 = vcmp.eq.f32.partialorder %v988_v6, 8.507059e+37  ;;  %1440 = vmatpush.msra.mxu2 %v2966_v40 }
 0x18c   : > { %v2920_v38 = vadd.f32 %v928_v27, %v920_v36  ;;  %v911_v27 = vadd.f32 %v2836_v37, %v644_v24  ;;  %v2987_v45 = vadd.f32 %v925_v32, %v917_v35  ;;  %1582 = vmatpush.msrb.mxu0 %v2966_v40 }
 0x18e   : > { %v2426_v50 = vpop.eup %2425  ;;  %v2968_v37 = vadd.f32 %v925_v32, %v911_v27 }
 0x18f   : > { %v965_v51 = vmul.f32 %v2426_v50, %v962_v46  ;;  %v2428_v53 = vpop.eup %2427  ;;  %vm970_vm2 = vweird.f32 %v2426_v50 }
 0x190   : > { %v980_v47 = vmul.f32 %v2428_v53, %v963_v48  ;;  %vm971_vm4 = vmor %vm969_vm3, %vm970_vm2  ;;  %vm985_vm6 = vweird.f32 %v2428_v53 }
 0x191   : > { %v966_v52 = vsub.f32 1.0, %v965_v51  ;;  %vm986_vm8 = vmor %vm984_vm7, %vm985_vm6 }
 0x192   : > { %v981_v56 = vsub.f32 1.0, %v980_v47 }
 0x193   : > { %v967_v54 = vmul.f32 %v2426_v50, %v966_v52 }
 0x194   : > { %v982_v62 = vmul.f32 %v2428_v53, %v981_v56 }
 0x195   : > { %v968_v55 = vadd.f32 %v2426_v50, %v967_v54 }
 0x196   : > { %v983_v1 = vadd.f32 %v2428_v53, %v982_v62 }
 0x197   : > { %v972_v61 = vsel %vm971_vm4, %v2426_v50, %v968_v55 }
 0x198   : > { %v977_v0 = vsel %vm974_vm5, %v976_v63, %v972_v61  ;;  %v987_v12 = vsel %vm986_vm8, %v2428_v53, %v983_v1 }
 0x199   : > { %v996_v3 = vsub.f32 1.0, %v977_v0  ;;  %v992_v15 = vsel %vm989_vm9, %v991_v14, %v987_v12 }
 0x19a   : > { %v997_v16 = vsub.f32 1.0, %v992_v15 }
 0x1ef   : > { %v1001_v10 = vpop.permute.xlu0 %1000 }
 0x1f0   : > { %v2924_v11 = vmul.f32 %v1001_v10, %v996_v3 }
 0x1f2   : > { %2302 = vmatmul.msk.f32.vlgmr.msrb.gmra.mxu1 %vm452_vm1, %v2924_v11  ;;  %1168 = vrot.lane.b32.xlu0 %v2924_v11, %s2631_s18 }
 0x1f3   : > { %1638 = vmatpush.msrb.mxu1 %v2862_v4 }
 0x1f5   : > { %1639 = vmatpush.msrb.mxu1 %v2867_v5 }
 0x1f7   : > { %v1003_v17 = vpop.permute.xlu0 %1002  ;;  %1640 = vmatpush.msrb.mxu1 %v2876_v8 }
 0x1f8   : > { %v2933_v20 = vmul.f32 %v1003_v17, %v997_v16 }
 0x1f9   : > { %1641 = vmatpush.msrb.mxu1 %v2887_v13 }
 0x1fa   : > { %2303 = vmatmul.msk.f32.gmra.mxu1 %vm452_vm1, %v2933_v20 }
 0x26f   : > { %v1031_v21 = vpop.f32.mrf.mxu1 }
 0x270   : > { %1039 = vrot.lane.b32.xlu1 %v1031_v21, %s2631_s18 }
 0x277   : > { %v1034_v22 = vpop.f32.mrf.mxu1 }
 0x278   : > { %1041 = vrot.lane.b32.xlu1 %v1034_v22, %s2631_s18 }
 0x2e2   : > { %v2974_v33 = vpop.permute.xlu1 %1039 }
 0x2e3   : > { %v1046_v31 = vadd.f32 %v2974_v33, %v2968_v37  ;;  %v1045_v32 = vadd.f32 %v2974_v33, %v2893_v18 }
 0x2e5   : > { %v2305_v28 = vmul.f32 -1.442695, %v1046_v31  ;;  %v2304_v49 = vmul.f32 -1.442695, %v1045_v32 }
 0x2e7   : > { %2429 = vpow2.f32 %v2305_v28 }
 0x2ea   : > { %v2989_v36 = vpop.permute.xlu1 %1041 }
 0x2eb   : > { %v1048_v42 = vadd.f32 %v2989_v36, %v2987_v45 }
 0x2ed   : > { %v2430_v39 = vpop.eup %2429  ;;  %v2307_v41 = vmul.f32 -1.442695, %v1048_v42 }
 0x2ee   : > { %v1062_v44 = vadd.f32 1.0, %v2430_v39 }
 0x2f0   : > { %2431 = vrcp.f32 %v1062_v44  ;;  %v1091_v52 = vand.u32 2147483648, %v1062_v44  ;;  %v1089_v54 = vand.u32 2147483647, %v1062_v44  ;;  %vm1085_vm11 = vweird.f32 %v1062_v44 }
 0x2f1   : > { %2433 = vpow2.f32 %v2307_v41 }
 0x2f2   : > { %v1092_v55 = vor.u32 1.1754944e-38, %v1091_v52  ;;  %vm1090_vm13 = vcmp.eq.f32.partialorder %v1089_v54, 8.507059e+37 }
 0x2f6   : > { %v2432_v46 = vpop.eup %2431 }
 0x2f7   : > { %v2434_v43 = vpop.eup %2433  ;;  %v1081_v48 = vmul.f32 %v2432_v46, %v1062_v44  ;;  %vm1086_vm10 = vweird.f32 %v2432_v46 }
 0x2f8   : > { %v1064_v50 = vadd.f32 1.0, %v2434_v43  ;;  %vm1087_vm12 = vmor %vm1085_vm11, %vm1086_vm10 }
 0x2f9   : > { %v1082_v51 = vsub.f32 1.0, %v1081_v48 }
 0x2fa   : > { %2435 = vrcp.f32 %v1064_v50  ;;  %v1121_v0 = vand.u32 2147483648, %v1064_v50  ;;  %v1119_v2 = vand.u32 2147483647, %v1064_v50  ;;  %vm1115_vm15 = vweird.f32 %v1064_v50 }
 0x2fb   : > { %v1083_v53 = vmul.f32 %v2432_v46, %v1082_v51 }
 0x2fc   : > { %v1122_v6 = vor.u32 1.1754944e-38, %v1121_v0  ;;  %vm1120_vm2 = vcmp.eq.f32.partialorder %v1119_v2, 8.507059e+37 }
 0x2fd   : > { %v1084_v47 = vadd.f32 %v2432_v46, %v1083_v53 }
 0x2ff   : > { %v1088_v56 = vsel %vm1087_vm12, %v2432_v46, %v1084_v47 }
 0x300   : > { %v2436_v57 = vpop.eup %2435  ;;  %v1093_v58 = vsel %vm1090_vm13, %v1092_v55, %v1088_v56  ;;  %v1169_v56 = vpop.permute.xlu0 %1168 }
 0x301   : > { %v1125_v61 = vmul.f32 %v1093_v58, %v2924_v11  ;;  %v1111_v62 = vmul.f32 %v2436_v57, %v1064_v50  ;;  %vm1116_vm14 = vweird.f32 %v2436_v57 }
 0x302   : > { %vm1117_vm0 = vmor %vm1115_vm15, %vm1116_vm14 }
 0x303   : > { %2308 = vmatmul.msk.f32.vlgmr.msrb.gmra.mxu2 %vm452_vm1, %v1125_v61  ;;  %v1112_v63 = vsub.f32 1.0, %v1111_v62 }
 0x304   : > { %1757 = vmatpush.msrb.mxu2 %v2945_v25 }
 0x305   : > { %v1113_v1 = vmul.f32 %v2436_v57, %v1112_v63 }
 0x306   : > { %1758 = vmatpush.msrb.mxu2 %v2950_v26 }
 0x307   : > { %v1114_v3 = vadd.f32 %v2436_v57, %v1113_v1 }
 0x308   : > { %1759 = vmatpush.msrb.mxu2 %v2959_v23 }
 0x309   : > { %v1118_v10 = vsel %vm1117_vm0, %v2436_v57, %v1114_v3 }
 0x30a   : > { %v1123_v11 = vsel %vm1120_vm2, %v1122_v6, %v1118_v10  ;;  %1760 = vmatpush.msrb.mxu2 %v2966_v40 }
 0x30b   : > { %v1126_v12 = vmul.f32 %v1123_v11, %v2933_v20 }
 0x30d   : > { %2309 = vmatmul.msk.f32.gmra.mxu2 %vm452_vm1, %v1126_v12 }
 0x386   : > { %v1150_v14 = vpop.f32.mrf.mxu2 }
 0x387   : > { %1158 = vrot.lane.b32.xlu2 %v1150_v14, %s2632_s10 }
 0x390   : > { %v1153_v15 = vpop.f32.mrf.mxu2 }
 0x391   : > { %1160 = vrot.lane.b32.xlu2 %v1153_v15, %s2632_s10 }
 0x399   : > { %1170 = vrot.lane.b32.xlu2 %v2933_v20, %s2631_s18  ;;  %v1047_v20 = vadd.f32 %v2989_v36, %v2908_v29 }
 0x39b   : > { %v2306_v35 = vmul.f32 -1.442695, %v1047_v20 }
 0x3e1   : > { %v1159_v16 = vpop.permute.xlu2 %1158 }
 0x3e2   : > { %v1164_v17 = vadd.f32 %v1159_v16, %v2968_v37 }
 0x3e4   : > { %2437 = vtanh.f32 %v1164_v17 }
 0x3ea   : > { %v2438_v21 = vpop.eup %2437 }
 0x3eb   : > { %v1161_v22 = vpop.permute.xlu2 %1160  ;;  %1180 = vrot.lane.b32.xlu1 %v2438_v21, %s2630_s17 }
 0x3ec   : > { %v1165_v24 = vadd.f32 %v1161_v22, %v2987_v45 }
 0x3ee   : > { %2439 = vtanh.f32 %v1165_v24 }
 0x3ef   : > { %2441 = vpow2.f32 %v2304_v49 }
 0x3f0   : > { %2443 = vpow2.f32 %v2306_v35 }
 0x3f3   : > { %v1171_v6 = vpop.permute.xlu2 %1170 }
 0x3f4   : > { %v2440_v27 = vpop.eup %2439 }
 0x3f5   : > { %1182 = vrot.lane.b32.xlu0 %v2440_v27, %s2630_s17  ;;  %v2442_v31 = vpop.eup %2441 }
 0x3f6   : > { %v1061_v28 = vadd.f32 1.0, %v2442_v31  ;;  %v2444_v42 = vpop.eup %2443 }
 0x3f7   : > { %v1063_v41 = vadd.f32 1.0, %v2444_v42 }
 0x3f8   : > { %2445 = vrcp.f32 %v1061_v28  ;;  %v1076_v33 = vand.u32 2147483648, %v1061_v28  ;;  %vm1070_vm4 = vweird.f32 %v1061_v28  ;;  %v1074_v29 = vand.u32 2147483647, %v1061_v28 }
 0x3f9   : > { %2447 = vrcp.f32 %v1063_v41  ;;  %v1106_v57 = vand.u32 2147483648, %v1063_v41  ;;  %vm1100_vm8 = vweird.f32 %v1063_v41  ;;  %v1104_v61 = vand.u32 2147483647, %v1063_v41 }
 0x3fa   : > { %v1077_v52 = vor.u32 1.1754944e-38, %v1076_v33  ;;  %vm1075_vm6 = vcmp.eq.f32.partialorder %v1074_v29, 8.507059e+37 }
 0x3fb   : > { %v1107_v2 = vor.u32 1.1754944e-38, %v1106_v57  ;;  %vm1105_vm10 = vcmp.eq.f32.partialorder %v1104_v61, 8.507059e+37 }
 0x3fe   : > { %v2446_v39 = vpop.eup %2445 }
 0x3ff   : > { %v1066_v44 = vmul.f32 %v2446_v39, %v1061_v28  ;;  %v2448_v43 = vpop.eup %2447  ;;  %vm1071_vm3 = vweird.f32 %v2446_v39 }
 0x400   : > { %v1096_v50 = vmul.f32 %v2448_v43, %v1063_v41  ;;  %vm1072_vm5 = vmor %vm1070_vm4, %vm1071_vm3  ;;  %vm1101_vm7 = vweird.f32 %v2448_v43 }
 0x401   : > { %v1067_v46 = vsub.f32 1.0, %v1066_v44  ;;  %vm1102_vm9 = vmor %vm1100_vm8, %vm1101_vm7 }
 0x402   : > { %v1097_v51 = vsub.f32 1.0, %v1096_v50 }
 0x403   : > { %v1068_v48 = vmul.f32 %v2446_v39, %v1067_v46 }
 0x404   : > { %v1098_v53 = vmul.f32 %v2448_v43, %v1097_v51 }
 0x405   : > { %v1069_v18 = vadd.f32 %v2446_v39, %v1068_v48 }
 0x406   : > { %v1099_v47 = vadd.f32 %v2448_v43, %v1098_v53 }
 0x407   : > { %v1073_v36 = vsel %vm1072_vm5, %v2446_v39, %v1069_v18 }
 0x408   : > { %v1078_v54 = vsel %vm1075_vm6, %v1077_v52, %v1073_v36  ;;  %v1103_v0 = vsel %vm1102_vm9, %v2448_v43, %v1099_v47 }
 0x409   : > { %v1176_v55 = vsub.f32 1.0, %v1078_v54  ;;  %v1174_v62 = vmul.f32 %v1169_v56, %v1078_v54  ;;  %v1108_v3 = vsel %vm1105_vm10, %v1107_v2, %v1103_v0 }
 0x40a   : > { %v1177_v10 = vsub.f32 1.0, %v1108_v3  ;;  %v1175_v12 = vmul.f32 %v1171_v6, %v1108_v3 }
 0x45d   : > { %v1181_v58 = vpop.permute.xlu1 %1180 }
 0x45e   : > { %v1186_v63 = vmul.f32 %v1181_v58, %v1176_v55 }
 0x460   : > { %v1188_v1 = vadd.f32 %v1186_v63, %v1174_v62 }
 0x462   : > { %1192 = vrot.lane.b32.xlu1 %v1188_v1, %s2632_s10 }
 0x467   : > { %v1183_v11 = vpop.permute.xlu0 %1182 }
 0x468   : > { %v1187_v14 = vmul.f32 %v1183_v11, %v1177_v10 }
 0x46a   : > { %v1189_v15 = vadd.f32 %v1187_v14, %v1175_v12 }
 0x46c   : > { %1194 = vrot.lane.b32.xlu2 %v1189_v15, %s2632_s10 }
 0x4c6   : > { %v1195_v17 = vpop.permute.xlu2 %1194 }
 0x4d4   : > { %v1193_v16 = vpop.permute.xlu1 %1192 }
 0x4d5   : > { %2310 = vmatmul.msk.f32.vlgmr.msra.gmra.mxu3 %vm452_vm1, %v1193_v16 }
 0x4d6   : > { %1824 = vmatpush.msra.mxu3 %v2862_v4 }
 0x4d8   : > { %1825 = vmatpush.msra.mxu3 %v2867_v5 }
 0x4da   : > { %1826 = vmatpush.msra.mxu3 %v2876_v8 }
 0x4dc   : > { %1827 = vmatpush.msra.mxu3 %v2887_v13 }
 0x4dd   : > { %2311 = vmatmul.msk.f32.gmra.mxu3 %vm452_vm1, %v1195_v17 }
 0x558   : > { %v1217_v21 = vpop.f32.mrf.mxu3 }
 0x559   : > { %1225 = vrot.lane.b32.xlu0 %v1217_v21, %s2630_s17 }
 0x560   : > { %v1220_v22 = vpop.f32.mrf.mxu3 }
 0x561   : > { %1227 = vrot.lane.b32.xlu1 %v1220_v22, %s2630_s17 }
 0x569   : > { %1310 = vrot.lane.b32.xlu1 %v1188_v1, %s2631_s18 }
 0x5cb   : > { %v1226_v24 = vpop.permute.xlu0 %1225 }
 0x5cc   : > { %v1231_v27 = vadd.f32 %v1226_v24, %v2968_v37 }
 0x5ce   : > { %v2312_v32 = vmul.f32 -1.442695, %v1231_v27 }
 0x5d0   : > { %2449 = vpow2.f32 %v2312_v32 }
 0x5d3   : > { %v1228_v49 = vpop.permute.xlu1 %1227 }
 0x5d4   : > { %v1232_v20 = vadd.f32 %v1228_v49, %v2987_v45 }
 0x5d6   : > { %v2450_v31 = vpop.eup %2449  ;;  %v2313_v35 = vmul.f32 -1.442695, %v1232_v20 }
 0x5d7   : > { %v1239_v28 = vadd.f32 1.0, %v2450_v31 }
 0x5d8   : > { %2451 = vpow2.f32 %v2313_v35 }
 0x5d9   : > { %2453 = vrcp.f32 %v1239_v28  ;;  %v1252_v43 = vand.u32 2147483648, %v1239_v28  ;;  %v1250_v37 = vand.u32 2147483647, %v1239_v28  ;;  %vm1246_vm12 = vweird.f32 %v1239_v28 }
 0x5db   : > { %v1253_v45 = vor.u32 1.1754944e-38, %v1252_v43  ;;  %vm1251_vm14 = vcmp.eq.f32.partialorder %v1250_v37, 8.507059e+37  ;;  %v1311_v12 = vpop.permute.xlu1 %1310 }
 0x5de   : > { %v2452_v42 = vpop.eup %2451 }
 0x5df   : > { %v2454_v39 = vpop.eup %2453  ;;  %v1240_v41 = vadd.f32 1.0, %v2452_v42 }
 0x5e0   : > { %v1242_v44 = vmul.f32 %v2454_v39, %v1239_v28  ;;  %vm1247_vm11 = vweird.f32 %v2454_v39 }
 0x5e1   : > { %2455 = vrcp.f32 %v1240_v41  ;;  %vm1248_vm13 = vmor %vm1246_vm12, %vm1247_vm11  ;;  %v1267_v53 = vand.u32 2147483648, %v1240_v41  ;;  %v1265_v47 = vand.u32 2147483647, %v1240_v41  ;;  %vm1261_vm0 = vweird.f32 %v1240_v41 }
 0x5e2   : > { %v1243_v46 = vsub.f32 1.0, %v1242_v44 }
 0x5e3   : > { %v1268_v56 = vor.u32 1.1754944e-38, %v1267_v53  ;;  %vm1266_vm3 = vcmp.eq.f32.partialorder %v1265_v47, 8.507059e+37 }
 0x5e4   : > { %v1244_v48 = vmul.f32 %v2454_v39, %v1243_v46 }
 0x5e6   : > { %v1245_v50 = vadd.f32 %v2454_v39, %v1244_v48 }
 0x5e7   : > { %v2456_v18 = vpop.eup %2455 }
 0x5e8   : > { %v1257_v33 = vmul.f32 %v2456_v18, %v1240_v41  ;;  %v1249_v51 = vsel %vm1248_vm13, %v2454_v39, %v1245_v50  ;;  %vm1262_vm15 = vweird.f32 %v2456_v18 }
 0x5e9   : > { %v1254_v29 = vsel %vm1251_vm14, %v1253_v45, %v1249_v51  ;;  %vm1263_vm2 = vmor %vm1261_vm0, %vm1262_vm15 }
 0x5ea   : > { %v1258_v36 = vsub.f32 1.0, %v1257_v33  ;;  %v1271_v52 = vmul.f32 %v1254_v29, %v1188_v1  ;;  %v1318_v11 = vsub.f32 1.0, %v1254_v29 }
 0x5ec   : > { %1275 = vrot.lane.b32.xlu2 %v1271_v52, %s2632_s10  ;;  %v1259_v54 = vmul.f32 %v2456_v18, %v1258_v36 }
 0x5ee   : > { %v1260_v55 = vadd.f32 %v2456_v18, %v1259_v54 }
 0x5f0   : > { %v1264_v57 = vsel %vm1263_vm2, %v2456_v18, %v1260_v55 }
 0x5f1   : > { %v1269_v58 = vsel %vm1266_vm3, %v1268_v56, %v1264_v57 }
 0x5f2   : > { %v1272_v61 = vmul.f32 %v1269_v58, %v1189_v15  ;;  %v1319_v22 = vsub.f32 1.0, %v1269_v58 }
 0x5f4   : > { %1277 = vrot.lane.b32.xlu0 %v1272_v61, %s2632_s10 }
 0x5fc   : > { %1312 = vrot.lane.b32.xlu0 %v1189_v15, %s2631_s18  ;;  %v1316_v15 = vmul.f32 %v1311_v12, %v1254_v29 }
 0x646   : > { %v1276_v62 = vpop.permute.xlu2 %1275 }
 0x647   : > { %2314 = vmatmul.msk.f32.vlgmr.msra.gmra.mxu0 %vm452_vm1, %v1276_v62 }
 0x648   : > { %1907 = vmatpush.msra.mxu0 %v2945_v25 }
 0x64a   : > { %1908 = vmatpush.msra.mxu0 %v2950_v26 }
 0x64c   : > { %1909 = vmatpush.msra.mxu0 %v2959_v23 }
 0x64e   : > { %1910 = vmatpush.msra.mxu0 %v2966_v40 }
 0x666   : > { %v1278_v63 = vpop.permute.xlu0 %1277 }
 0x667   : > { %2315 = vmatmul.msk.f32.gmra.mxu0 %vm452_vm1, %v1278_v63 }
 0x66e   : > { %v1313_v21 = vpop.permute.xlu0 %1312 }
 0x66f   : > { %v1317_v27 = vmul.f32 %v1313_v21, %v1269_v58 }
 0x6c4   : > { %v1300_v0 = vpop.f32.mrf.mxu0 }
 0x6c5   : > { %v1306_v1 = vadd.f32 %v1300_v0, %v2857_v60 }
 0x6c7   : > { %2457 = vtanh.f32 %v1306_v1 }
 0x6cd   : > { %v2458_v2 = vpop.eup %2457 }
 0x6ce   : > { %1322 = vrot.lane.b32.xlu2 %v2458_v2, %s2630_s17 }
 0x6e4   : > { %v1303_v3 = vpop.f32.mrf.mxu0 }
 0x6e5   : > { %v1307_v6 = vadd.f32 %v1303_v3, %v2878_v9 }
 0x6e7   : > { %2459 = vtanh.f32 %v1307_v6 }
 0x6ed   : > { %v2460_v10 = vpop.eup %2459 }
 0x6ee   : > { %1324 = vrot.lane.b32.xlu1 %v2460_v10, %s2630_s17 }
 0x728   : > { %v1323_v14 = vpop.permute.xlu2 %1322 }
 0x729   : > { %v1328_v16 = vmul.f32 %v1323_v14, %v1318_v11 }
 0x72b   : > { %v3041_v17 = vadd.f32 %v1328_v16, %v1316_v15 }
 0x72d   : > { %1334 = vrot.lane.b32.xlu2 %v3041_v17, %s2630_s17 }
 0x760   : > { %v1325_v24 = vpop.permute.xlu1 %1324 }
 0x761   : > { %v1329_v32 = vmul.f32 %v1325_v24, %v1319_v22 }
 0x763   : > { %v3045_v49 = vadd.f32 %v1329_v32, %v1317_v27 }
 0x765   : > { %1336 = vrot.lane.b32.xlu0 %v3045_v49, %s2630_s17 }
 0x787   : > { %v1335_v20 = vpop.permute.xlu2 %1334 }
 0x788   : > { %2316 = vmatmul.msk.f32.vlgmr.msra.gmra.mxu1 %vm452_vm1, %v1335_v20 }
 0x789   : > { %1966 = vmatpush.msra.mxu1 %v2862_v4 }
 0x78b   : > { %1967 = vmatpush.msra.mxu1 %v2867_v5 }
 0x78d   : > { %1968 = vmatpush.msra.mxu1 %v2876_v8 }
 0x78f   : > { %1969 = vmatpush.msra.mxu1 %v2887_v13 }
 0x7d7   : > { %v1337_v31 = vpop.permute.xlu0 %1336 }
 0x7d8   : > { %2317 = vmatmul.msk.f32.gmra.mxu1 %vm452_vm1, %v1337_v31 }
 0x805   : > { %v1359_v35 = vpop.f32.mrf.mxu1 }
 0x806   : > { %1367 = vrot.lane.b32.xlu1 %v1359_v35, %s2632_s10 }
 0x855   : > { %v1362_v28 = vpop.f32.mrf.mxu1 }
 0x856   : > { %1369 = vrot.lane.b32.xlu2 %v1362_v28, %s2632_s10 }
 0x878   : > { %v1368_v42 = vpop.permute.xlu1 %1367 }
 0x879   : > { %v1373_v39 = vadd.f32 %v1368_v42, %v2857_v60 }
 0x87b   : > { %v2318_v41 = vmul.f32 -1.442695, %v1373_v39 }
 0x87d   : > { %2461 = vpow2.f32 %v2318_v41 }
 0x883   : > { %v2462_v4 = vpop.eup %2461 }
 0x884   : > { %v1381_v5 = vadd.f32 1.0, %v2462_v4 }
 0x886   : > { %2463 = vrcp.f32 %v1381_v5  ;;  %v1394_v46 = vand.u32 2147483648, %v1381_v5  ;;  %v1392_v48 = vand.u32 2147483647, %v1381_v5  ;;  %vm1388_vm5 = vweird.f32 %v1381_v5 }
 0x888   : > { %v1395_v50 = vor.u32 1.1754944e-38, %v1394_v46  ;;  %vm1393_vm7 = vcmp.eq.f32.partialorder %v1392_v48, 8.507059e+37 }
 0x88c   : > { %v2464_v8 = vpop.eup %2463 }
 0x88d   : > { %v1384_v44 = vmul.f32 %v2464_v8, %v1381_v5  ;;  %vm1389_vm4 = vweird.f32 %v2464_v8 }
 0x88e   : > { %vm1390_vm6 = vmor %vm1388_vm5, %vm1389_vm4 }
 0x88f   : > { %v1385_v13 = vsub.f32 1.0, %v1384_v44 }
 0x891   : > { %v1386_v43 = vmul.f32 %v2464_v8, %v1385_v13 }
 0x893   : > { %v1387_v37 = vadd.f32 %v2464_v8, %v1386_v43 }
 0x895   : > { %v1391_v18 = vsel %vm1390_vm6, %v2464_v8, %v1387_v37 }
 0x896   : > { %v1396_v45 = vsel %vm1393_vm7, %v1395_v50, %v1391_v18 }
 0x897   : > { %v1413_v33 = vmul.f32 %v1396_v45, %v3041_v17  ;;  %v1468_v15 = vsub.f32 1.0, %v1396_v45 }
 0x899   : > { %1417 = vrot.lane.b32.xlu0 %v1413_v33, %s2630_s17 }
 0x8b0   : > { %v1370_v51 = vpop.permute.xlu2 %1369 }
 0x8b1   : > { %v1374_v29 = vadd.f32 %v1370_v51, %v2878_v9 }
 0x8b3   : > { %v2319_v36 = vmul.f32 -1.442695, %v1374_v29 }
 0x8b5   : > { %2465 = vpow2.f32 %v2319_v36 }
 0x8bb   : > { %v2466_v52 = vpop.eup %2465 }
 0x8bc   : > { %v1382_v53 = vadd.f32 1.0, %v2466_v52 }
 0x8be   : > { %2467 = vrcp.f32 %v1382_v53  ;;  %v1409_v56 = vand.u32 2147483648, %v1382_v53  ;;  %v1407_v58 = vand.u32 2147483647, %v1382_v53  ;;  %vm1403_vm9 = vweird.f32 %v1382_v53 }
 0x8c0   : > { %v1410_v62 = vor.u32 1.1754944e-38, %v1409_v56  ;;  %vm1408_vm11 = vcmp.eq.f32.partialorder %v1407_v58, 8.507059e+37 }
 0x8c4   : > { %v2468_v54 = vpop.eup %2467 }
 0x8c5   : > { %v1399_v47 = vmul.f32 %v2468_v54, %v1382_v53  ;;  %vm1404_vm8 = vweird.f32 %v2468_v54 }
 0x8c6   : > { %vm1405_vm10 = vmor %vm1403_vm9, %vm1404_vm8 }
 0x8c7   : > { %v1400_v55 = vsub.f32 1.0, %v1399_v47 }
 0x8c9   : > { %v1401_v57 = vmul.f32 %v2468_v54, %v1400_v55 }
 0x8cb   : > { %v1402_v61 = vadd.f32 %v2468_v54, %v1401_v57 }
 0x8cd   : > { %v1406_v63 = vsel %vm1405_vm10, %v2468_v54, %v1402_v61 }
 0x8ce   : > { %v1411_v0 = vsel %vm1408_vm11, %v1410_v62, %v1406_v63 }
 0x8cf   : > { %v1414_v1 = vmul.f32 %v1411_v0, %v3045_v49  ;;  %v1469_v27 = vsub.f32 1.0, %v1411_v0 }
 0x8d1   : > { %1419 = vrot.lane.b32.xlu1 %v1414_v1, %s2630_s17 }
 0x8d9   : > { %1460 = vrot.lane.b32.xlu1 %v3041_v17, %s2631_s18 }
 0x90b   : > { %v1418_v2 = vpop.permute.xlu0 %1417 }
 0x90c   : > { %2320 = vmatmul.msk.f32.vlgmr.msra.gmra.mxu2 %vm452_vm1, %v1418_v2 }
 0x90d   : > { %2049 = vmatpush.msra.mxu2 %v2945_v25 }
 0x90f   : > { %2050 = vmatpush.msra.mxu2 %v2950_v26 }
 0x911   : > { %2051 = vmatpush.msra.mxu2 %v2959_v23 }
 0x913   : > { %2052 = vmatpush.msra.mxu2 %v2966_v40 }
 0x943   : > { %v1420_v3 = vpop.permute.xlu1 %1419 }
 0x944   : > { %2321 = vmatmul.msk.f32.gmra.mxu2 %vm452_vm1, %v1420_v3 }
 0x94b   : > { %v1461_v14 = vpop.permute.xlu1 %1460 }
 0x94c   : > { %v1466_v17 = vmul.f32 %v1461_v14, %v1396_v45 }
 0x98f   : > { %v1442_v6 = vpop.f32.mrf.mxu2 }
 0x990   : > { %1450 = vrot.lane.b32.xlu2 %v1442_v6, %s2631_s18 }
 0x9c7   : > { %v1445_v10 = vpop.f32.mrf.mxu2 }
 0x9c8   : > { %1452 = vrot.lane.b32.xlu0 %v1445_v10, %s2631_s18 }
 0x9d0   : > { %1462 = vrot.lane.b32.xlu0 %v3045_v49, %s2631_s18 }
 0x9ea   : > { %v1451_v11 = vpop.permute.xlu2 %1450 }
 0x9eb   : > { %v1456_v25 = vadd.f32 %v1451_v11, %v2857_v60 }
 0x9ed   : > { %2469 = vtanh.f32 %v1456_v25 }
 0x9f3   : > { %v2470_v26 = vpop.eup %2469 }
 0x9f4   : > { %1472 = vrot.lane.b32.xlu2 %v2470_v26, %s2630_s17 }
 0xa3a   : > { %v1453_v23 = vpop.permute.xlu0 %1452 }
 0xa3b   : > { %v1457_v40 = vadd.f32 %v1453_v23, %v2878_v9 }
 0xa3d   : > { %2471 = vtanh.f32 %v1457_v40 }
 0xa42   : > { %v1463_v24 = vpop.permute.xlu0 %1462 }
 0xa43   : > { %v2472_v12 = vpop.eup %2471  ;;  %v1467_v32 = vmul.f32 %v1463_v24, %v1411_v0 }
 0xa44   : > { %1474 = vrot.lane.b32.xlu1 %v2472_v12, %s2630_s17 }
 0xa4e   : > { %v1473_v16 = vpop.permute.xlu2 %1472 }
 0xa4f   : > { %v1478_v21 = vmul.f32 %v1473_v16, %v1468_v15 }
 0xa51   : > { %v1480_v22 = vadd.f32 %v1478_v21, %v1466_v17 }
 0xa53   : > { %1484 = vrot.lane.b32.xlu2 %v1480_v22, %s2631_s18 }
 0xaad   : > { %v3080_v60 = vpop.permute.xlu2 %1484 }
 0xaae   : > { %2322 = vmatmul.msk.f32.vlgmr.msrb.gmra.mxu3 %vm452_vm1, %v3080_v60 }
 0xab6   : > { %v1475_v9 = vpop.permute.xlu1 %1474 }
 0xab7   : > { %v1479_v49 = vmul.f32 %v1475_v9, %v1469_v27 }
 0xab9   : > { %v1481_v20 = vadd.f32 %v1479_v49, %v1467_v32 }
 0xabb   : > { %1486 = vrot.lane.b32.xlu0 %v1481_v20, %s2631_s18 }
 0xb2d   : > { %v3085_v31 = vpop.permute.xlu0 %1486 }
 0xb2e   : > { %2323 = vmatmul.msk.f32.gmra.mxu3 %vm452_vm1, %v3085_v31 }
 0xb31   : > { %v1509_v35 = vpop.f32.mrf.mxu3 }
 0xb32   : > { %v1515_v28 = vadd.f32 %v1509_v35, %v2895_v19 }
 0xb34   : > { %v2324_v42 = vmul.f32 -1.442695, %v1515_v28 }
 0xb36   : > { %2473 = vpow2.f32 %v2324_v42 }
 0xb3c   : > { %v2474_v39 = vpop.eup %2473 }
 0xb3d   : > { %v1523_v41 = vadd.f32 1.0, %v2474_v39 }
 0xb3f   : > { %2475 = vrcp.f32 %v1523_v41  ;;  %v1536_v44 = vand.u32 2147483648, %v1523_v41  ;;  %v1534_v46 = vand.u32 2147483647, %v1523_v41  ;;  %vm1530_vm13 = vweird.f32 %v1523_v41 }
 0xb41   : > { %v1537_v48 = vor.u32 1.1754944e-38, %v1536_v44  ;;  %vm1535_vm15 = vcmp.eq.f32.partialorder %v1534_v46, 8.507059e+37 }
 0xb45   : > { %v2476_v4 = vpop.eup %2475 }
 0xb46   : > { %v1526_v5 = vmul.f32 %v2476_v4, %v1523_v41  ;;  %vm1531_vm12 = vweird.f32 %v2476_v4 }
 0xb47   : > { %vm1532_vm14 = vmor %vm1530_vm13, %vm1531_vm12 }
 0xb48   : > { %v1527_v8 = vsub.f32 1.0, %v1526_v5 }
 0xb4a   : > { %v1528_v13 = vmul.f32 %v2476_v4, %v1527_v8 }
 0xb4c   : > { %v1529_v43 = vadd.f32 %v2476_v4, %v1528_v13 }
 0xb4e   : > { %v1533_v37 = vsel %vm1532_vm14, %v2476_v4, %v1529_v43 }
 0xb4f   : > { %v1538_v50 = vsel %vm1535_vm15, %v1537_v48, %v1533_v37 }
 0xb50   : > { %v1555_v18 = vmul.f32 %v1538_v50, %v1480_v22  ;;  %v1606_v25 = vsub.f32 1.0, %v1538_v50  ;;  %v1604_v23 = vmul.f32 %v1538_v50, %v3080_v60 }
 0xb52   : > { %1559 = vrot.lane.b32.xlu1 %v1555_v18, %s2631_s18 }
 0xbb1   : > { %v1512_v45 = vpop.f32.mrf.mxu3 }
 0xbb2   : > { %v1516_v33 = vadd.f32 %v1512_v45, %v2910_v30 }
 0xbb4   : > { %v2325_v51 = vmul.f32 -1.442695, %v1516_v33 }
 0xbb6   : > { %2477 = vpow2.f32 %v2325_v51 }
 0xbbc   : > { %v2478_v29 = vpop.eup %2477 }
 0xbbd   : > { %v1524_v36 = vadd.f32 1.0, %v2478_v29 }
 0xbbf   : > { %2479 = vrcp.f32 %v1524_v36  ;;  %v1551_v55 = vand.u32 2147483648, %v1524_v36  ;;  %v1549_v57 = vand.u32 2147483647, %v1524_v36  ;;  %vm1545_vm2 = vweird.f32 %v1524_v36 }
 0xbc1   : > { %v1552_v61 = vor.u32 1.1754944e-38, %v1551_v55  ;;  %vm1550_vm4 = vcmp.eq.f32.partialorder %v1549_v57, 8.507059e+37 }
 0xbc4   : > { %v1560_v52 = vpop.permute.xlu1 %1559 }
 0xbc5   : > { %v2480_v53 = vpop.eup %2479  ;;  %2326 = vmatmul.msk.f32.vlgmr.msrb.gmra.mxu0 %vm452_vm1, %v1560_v52 }
 0xbc6   : > { %v1541_v54 = vmul.f32 %v2480_v53, %v1524_v36  ;;  %vm1546_vm0 = vweird.f32 %v2480_v53 }
 0xbc7   : > { %vm1547_vm3 = vmor %vm1545_vm2, %vm1546_vm0 }
 0xbc8   : > { %v1542_v47 = vsub.f32 1.0, %v1541_v54 }
 0xbca   : > { %v1543_v56 = vmul.f32 %v2480_v53, %v1542_v47 }
 0xbcc   : > { %v1544_v58 = vadd.f32 %v2480_v53, %v1543_v56 }
 0xbce   : > { %v1548_v62 = vsel %vm1547_vm3, %v2480_v53, %v1544_v58 }
 0xbcf   : > { %v1553_v63 = vsel %vm1550_vm4, %v1552_v61, %v1548_v62 }
 0xbd0   : > { %v1556_v0 = vmul.f32 %v1553_v63, %v1481_v20  ;;  %v1607_v17 = vsub.f32 1.0, %v1553_v63  ;;  %v1605_v22 = vmul.f32 %v1553_v63, %v3085_v31 }
 0xbd2   : > { %1561 = vrot.lane.b32.xlu2 %v1556_v0, %s2631_s18 }
 0xc2c   : > { %v1562_v1 = vpop.permute.xlu2 %1561 }
 0xc2d   : > { %2327 = vmatmul.msk.f32.gmra.mxu0 %vm452_vm1, %v1562_v1 }
 0xc42   : > { %v1584_v2 = vpop.f32.mrf.mxu0 }
 0xc43   : > { %1592 = vrot.lane.b32.xlu0 %v1584_v2, %s2630_s17 }
 0xcaa   : > { %v1587_v3 = vpop.f32.mrf.mxu0 }
 0xcab   : > { %1594 = vrot.lane.b32.xlu1 %v1587_v3, %s2630_s17 }
 0xcb5   : > { %v1593_v6 = vpop.permute.xlu0 %1592 }
 0xcb6   : > { %v1598_v10 = vadd.f32 %v1593_v6, %v2895_v19 }
 0xcb8   : > { %2481 = vtanh.f32 %v1598_v10 }
 0xcbe   : > { %v2482_v11 = vpop.eup %2481 }
 0xcbf   : > { %1610 = vrot.lane.b32.xlu2 %v2482_v11, %s2630_s17 }
 0xd19   : > { %v1611_v26 = vpop.permute.xlu2 %1610 }
 0xd1a   : > { %v1616_v40 = vmul.f32 %v1611_v26, %v1606_v25 }
 0xd1c   : > { %v1618_v12 = vadd.f32 %v1616_v40, %v1604_v23 }
 0xd1d   : > { %v1595_v14 = vpop.permute.xlu1 %1594 }
 0xd1e   : > { %v1599_v15 = vadd.f32 %v1595_v14, %v2910_v30  ;;  %2328 = vmatmul.msk.f32.vlgmr.msrb.gmra.mxu1 %vm452_vm1, %v1618_v12 }
 0xd20   : > { %2483 = vtanh.f32 %v1599_v15 }
 0xd26   : > { %v2484_v16 = vpop.eup %2483 }
 0xd27   : > { %1612 = vrot.lane.b32.xlu0 %v2484_v16, %s2630_s17 }
 0xd99   : > { %v1613_v21 = vpop.permute.xlu0 %1612 }
 0xd9a   : > { %v1617_v24 = vmul.f32 %v1613_v21, %v1607_v17 }
 0xd9b   : > { %v1643_v27 = vpop.f32.mrf.mxu1 }
 0xd9c   : > { %v1619_v9 = vadd.f32 %v1617_v24, %v1605_v22  ;;  %1651 = vrot.lane.b32.xlu1 %v1643_v27, %s2631_s18 }
 0xd9e   : > { %2329 = vmatmul.msk.f32.gmra.mxu1 %vm452_vm1, %v1619_v9 }
 0xe0e   : > { %v1652_v60 = vpop.permute.xlu1 %1651 }
 0xe0f   : > { %v1658_v32 = vadd.f32 %v1652_v60, %v2916_v34  ;;  %v1657_v1 = vadd.f32 %v1652_v60, %v2895_v19 }
 0xe11   : > { %v2331_v49 = vmul.f32 -1.442695, %v1658_v32  ;;  %v2330_v2 = vmul.f32 -1.442695, %v1657_v1 }
 0xe13   : > { %2485 = vpow2.f32 %v2331_v49 }
 0xe19   : > { %v2486_v20 = vpop.eup %2485 }
 0xe1a   : > { %v1674_v35 = vadd.f32 1.0, %v2486_v20 }
 0xe1b   : > { %v1646_v28 = vpop.f32.mrf.mxu1 }
 0xe1c   : > { %1653 = vrot.lane.b32.xlu2 %v1646_v28, %s2631_s18  ;;  %2487 = vrcp.f32 %v1674_v35  ;;  %v1703_v41 = vand.u32 2147483648, %v1674_v35  ;;  %v1701_v5 = vand.u32 2147483647, %v1674_v35  ;;  %vm1697_vm6 = vweird.f32 %v1674_v35 }
 0xe1e   : > { %v1704_v44 = vor.u32 1.1754944e-38, %v1703_v41  ;;  %vm1702_vm8 = vcmp.eq.f32.partialorder %v1701_v5, 8.507059e+37 }
 0xe22   : > { %v2488_v42 = vpop.eup %2487 }
 0xe23   : > { %v1693_v31 = vmul.f32 %v2488_v42, %v1674_v35  ;;  %vm1698_vm5 = vweird.f32 %v2488_v42 }
 0xe24   : > { %1780 = vrot.lane.b32.xlu2 %v1618_v12, %s2631_s18  ;;  %vm1699_vm7 = vmor %vm1697_vm6, %vm1698_vm5 }
 0xe25   : > { %v1694_v39 = vsub.f32 1.0, %v1693_v31 }
 0xe27   : > { %v1695_v4 = vmul.f32 %v2488_v42, %v1694_v39 }
 0xe29   : > { %v1696_v8 = vadd.f32 %v2488_v42, %v1695_v4 }
 0xe2b   : > { %v1700_v13 = vsel %vm1699_vm7, %v2488_v42, %v1696_v8 }
 0xe2c   : > { %v1705_v46 = vsel %vm1702_vm8, %v1704_v44, %v1700_v13 }
 0xe2d   : > { %v1737_v43 = vmul.f32 %v1705_v46, %v1618_v12 }
 0xe2f   : > { %2334 = vmatmul.msk.f32.vlgmr.msrb.gmra.mxu2 %vm452_vm1, %v1737_v43 }
 0xe76   : > { %v3110_v48 = vpop.permute.xlu2 %1653 }
 0xe77   : > { %v1660_v37 = vadd.f32 %v3110_v48, %v2920_v38  ;;  %v1659_v49 = vadd.f32 %v3110_v48, %v2910_v30 }
 0xe79   : > { %v2333_v50 = vmul.f32 -1.442695, %v1660_v37  ;;  %v2332_v20 = vmul.f32 -1.442695, %v1659_v49 }
 0xe7b   : > { %2489 = vpow2.f32 %v2333_v50 }
 0xe7e   : > { %v1781_v22 = vpop.permute.xlu2 %1780 }
 0xe81   : > { %v2490_v18 = vpop.eup %2489 }
 0xe82   : > { %v1676_v45 = vadd.f32 1.0, %v2490_v18 }
 0xe84   : > { %2491 = vrcp.f32 %v1676_v45  ;;  %v1733_v36 = vand.u32 2147483648, %v1676_v45  ;;  %v1731_v53 = vand.u32 2147483647, %v1676_v45  ;;  %vm1727_vm10 = vweird.f32 %v1676_v45 }
 0xe86   : > { %v1734_v47 = vor.u32 1.1754944e-38, %v1733_v36  ;;  %vm1732_vm12 = vcmp.eq.f32.partialorder %v1731_v53, 8.507059e+37 }
 0xe8a   : > { %v2492_v33 = vpop.eup %2491 }
 0xe8b   : > { %v1723_v51 = vmul.f32 %v2492_v33, %v1676_v45  ;;  %vm1728_vm9 = vweird.f32 %v2492_v33 }
 0xe8c   : > { %vm1729_vm11 = vmor %vm1727_vm10, %vm1728_vm9 }
 0xe8d   : > { %v1724_v29 = vsub.f32 1.0, %v1723_v51 }
 0xe8f   : > { %v1725_v52 = vmul.f32 %v2492_v33, %v1724_v29 }
 0xe91   : > { %v1726_v54 = vadd.f32 %v2492_v33, %v1725_v52 }
 0xe93   : > { %v1730_v55 = vsel %vm1729_vm11, %v2492_v33, %v1726_v54 }
 0xe94   : > { %v1735_v56 = vsel %vm1732_vm12, %v1734_v47, %v1730_v55 }
 0xe95   : > { %v1738_v57 = vmul.f32 %v1735_v56, %v1619_v9 }
 0xe97   : > { %2335 = vmatmul.msk.f32.gmra.mxu2 %vm452_vm1, %v1738_v57 }
 0xeb2   : > { %v1762_v58 = vpop.f32.mrf.mxu2 }
 0xeb3   : > { %1770 = vrot.lane.b32.xlu0 %v1762_v58, %s2632_s10 }
 0xf1a   : > { %v1765_v61 = vpop.f32.mrf.mxu2 }
 0xf1b   : > { %1772 = vrot.lane.b32.xlu1 %v1765_v61, %s2632_s10 }
 0xf23   : > { %1782 = vrot.lane.b32.xlu1 %v1619_v9, %s2631_s18 }
 0xf25   : > { %v1771_v62 = vpop.permute.xlu0 %1770 }
 0xf26   : > { %v1776_v63 = vadd.f32 %v1771_v62, %v2916_v34 }
 0xf28   : > { %2493 = vtanh.f32 %v1776_v63 }
 0xf29   : > { %2495 = vpow2.f32 %v2330_v2 }
 0xf2e   : > { %v2494_v0 = vpop.eup %2493 }
 0xf2f   : > { %1792 = vrot.lane.b32.xlu0 %v2494_v0, %s2630_s17  ;;  %v2496_v3 = vpop.eup %2495 }
 0xf30   : > { %v1673_v6 = vadd.f32 1.0, %v2496_v3 }
 0xf32   : > { %2497 = vrcp.f32 %v1673_v6  ;;  %v1688_v15 = vand.u32 2147483648, %v1673_v6  ;;  %vm1682_vm14 = vweird.f32 %v1673_v6  ;;  %v1686_v19 = vand.u32 2147483647, %v1673_v6 }
 0xf34   : > { %v1689_v17 = vor.u32 1.1754944e-38, %v1688_v15  ;;  %vm1687_vm0 = vcmp.eq.f32.partialorder %v1686_v19, 8.507059e+37 }
 0xf38   : > { %v2498_v10 = vpop.eup %2497 }
 0xf39   : > { %v1678_v11 = vmul.f32 %v2498_v10, %v1673_v6  ;;  %vm1683_vm13 = vweird.f32 %v2498_v10 }
 0xf3a   : > { %vm1684_vm15 = vmor %vm1682_vm14, %vm1683_vm13 }
 0xf3b   : > { %v1679_v26 = vsub.f32 1.0, %v1678_v11 }
 0xf3d   : > { %v1680_v40 = vmul.f32 %v2498_v10, %v1679_v26 }
 0xf3f   : > { %v1681_v14 = vadd.f32 %v2498_v10, %v1680_v40 }
 0xf41   : > { %v1685_v16 = vsel %vm1684_vm15, %v2498_v10, %v1681_v14 }
 0xf42   : > { %v1690_v21 = vsel %vm1687_vm0, %v1689_v17, %v1685_v16 }
 0xf43   : > { %v1788_v24 = vsub.f32 1.0, %v1690_v21  ;;  %v1786_v9 = vmul.f32 %v1781_v22, %v1690_v21 }
 0xf8d   : > { %v1773_v25 = vpop.permute.xlu1 %1772 }
 0xf8e   : > { %v1777_v23 = vadd.f32 %v1773_v25, %v2920_v38 }
 0xf90   : > { %2499 = vtanh.f32 %v1777_v23 }
 0xf91   : > { %2501 = vpow2.f32 %v2332_v20 }
 0xf95   : > { %v1783_v30 = vpop.permute.xlu1 %1782 }
 0xf96   : > { %v2500_v12 = vpop.eup %2499 }
 0xf97   : > { %1794 = vrot.lane.b32.xlu2 %v2500_v12, %s2630_s17  ;;  %v2502_v35 = vpop.eup %2501 }
 0xf98   : > { %v1675_v28 = vadd.f32 1.0, %v2502_v35 }
 0xf9a   : > { %2503 = vrcp.f32 %v1675_v28  ;;  %v1718_v5 = vand.u32 2147483648, %v1675_v28  ;;  %vm1712_vm3 = vweird.f32 %v1675_v28  ;;  %v1716_v8 = vand.u32 2147483647, %v1675_v28 }
 0xf9c   : > { %v1719_v13 = vor.u32 1.1754944e-38, %v1718_v5  ;;  %vm1717_vm5 = vcmp.eq.f32.partialorder %v1716_v8, 8.507059e+37 }
 0xfa0   : > { %v2504_v42 = vpop.eup %2503 }
 0xfa1   : > { %v1793_v27 = vpop.permute.xlu0 %1792  ;;  %v1708_v31 = vmul.f32 %v2504_v42, %v1675_v28  ;;  %vm1713_vm2 = vweird.f32 %v2504_v42 }
 0xfa2   : > { %v1798_v60 = vmul.f32 %v1793_v27, %v1788_v24  ;;  %vm1714_vm4 = vmor %vm1712_vm3, %vm1713_vm2 }
 0xfa3   : > { %v1709_v39 = vsub.f32 1.0, %v1708_v31 }
 0xfa4   : > { %v1800_v32 = vadd.f32 %v1798_v60, %v1786_v9 }
 0xfa5   : > { %v1710_v41 = vmul.f32 %v2504_v42, %v1709_v39 }
 0xfa6   : > { %1804 = vrot.lane.b32.xlu0 %v1800_v32, %s2632_s10 }
 0xfa7   : > { %v1711_v4 = vadd.f32 %v2504_v42, %v1710_v41 }
 0xfa9   : > { %v1715_v44 = vsel %vm1714_vm4, %v2504_v42, %v1711_v4 }
 0xfaa   : > { %v1720_v46 = vsel %vm1717_vm5, %v1719_v13, %v1715_v44 }
 0xfab   : > { %v1789_v43 = vsub.f32 1.0, %v1720_v46  ;;  %v1787_v37 = vmul.f32 %v1783_v30, %v1720_v46 }
 0xff1   : > { %v1795_v48 = vpop.permute.xlu2 %1794 }
 0xff2   : > { %v1799_v50 = vmul.f32 %v1795_v48, %v1789_v43 }
 0xff4   : > { %v1801_v18 = vadd.f32 %v1799_v50, %v1787_v37 }
 0xff6   : > { %1806 = vrot.lane.b32.xlu1 %v1801_v18, %s2632_s10 }
0x1018   : > { %v1805_v45 = vpop.permute.xlu0 %1804 }
0x1019   : > { %2336 = vmatmul.msk.f32.vlgmr.msra.gmra.mxu3 %vm452_vm1, %v1805_v45 }
0x1068   : > { %v1807_v33 = vpop.permute.xlu1 %1806 }
0x1069   : > { %2337 = vmatmul.msk.f32.gmra.mxu3 %vm452_vm1, %v1807_v33 }
0x109c   : > { %v1829_v51 = vpop.f32.mrf.mxu3 }
0x109d   : > { %1837 = vrot.lane.b32.xlu2 %v1829_v51, %s2630_s17 }
0x10ec   : > { %v1832_v29 = vpop.f32.mrf.mxu3 }
0x10ed   : > { %1839 = vrot.lane.b32.xlu0 %v1832_v29, %s2630_s17 }
0x10f5   : > { %1922 = vrot.lane.b32.xlu0 %v1800_v32, %s2631_s18 }
0x10f7   : > { %v1838_v36 = vpop.permute.xlu2 %1837 }
0x10f8   : > { %v1843_v52 = vadd.f32 %v1838_v36, %v2916_v34 }
0x10fa   : > { %v2338_v53 = vmul.f32 -1.442695, %v1843_v52 }
0x10fc   : > { %2505 = vpow2.f32 %v2338_v53 }
0x1102   : > { %v2506_v54 = vpop.eup %2505 }
0x1103   : > { %v1851_v47 = vadd.f32 1.0, %v2506_v54 }
0x1105   : > { %2507 = vrcp.f32 %v1851_v47  ;;  %v1864_v58 = vand.u32 2147483648, %v1851_v47  ;;  %v1862_v62 = vand.u32 2147483647, %v1851_v47  ;;  %vm1858_vm7 = vweird.f32 %v1851_v47 }
0x1107   : > { %v1865_v0 = vor.u32 1.1754944e-38, %v1864_v58  ;;  %vm1863_vm9 = vcmp.eq.f32.partialorder %v1862_v62, 8.507059e+37 }
0x110b   : > { %v2508_v55 = vpop.eup %2507 }
0x110c   : > { %v1854_v56 = vmul.f32 %v2508_v55, %v1851_v47  ;;  %vm1859_vm6 = vweird.f32 %v2508_v55 }
0x110d   : > { %vm1860_vm8 = vmor %vm1858_vm7, %vm1859_vm6  ;;  %vm2116_vm7 = vcmask 523264  }
0x110e   : > { %v1855_v57 = vsub.f32 1.0, %v1854_v56 }
0x1110   : > { %v1856_v61 = vmul.f32 %v2508_v55, %v1855_v57 }
0x1112   : > { %v1857_v63 = vadd.f32 %v2508_v55, %v1856_v61 }
0x1114   : > { %v1861_v1 = vsel %vm1860_vm8, %v2508_v55, %v1857_v63  ;;  %vm2119_vm8 = vcmask 785408  }
0x1115   : > { %v1866_v2 = vsel %vm1863_vm9, %v1865_v0, %v1861_v1 }
0x1116   : > { %v1883_v34 = vmul.f32 %v1866_v2, %v1800_v32  ;;  %v1930_v28 = vsub.f32 1.0, %v1866_v2 }
0x1118   : > { %1887 = vrot.lane.b32.xlu1 %v1883_v34, %s2632_s10 }
0x115f   : > { %v1840_v3 = vpop.permute.xlu0 %1839 }
0x1160   : > { %v1844_v6 = vadd.f32 %v1840_v3, %v2920_v38 }
0x1162   : > { %v2339_v10 = vmul.f32 -1.442695, %v1844_v6 }
0x1164   : > { %2509 = vpow2.f32 %v2339_v10 }
0x1167   : > { %v1923_v35 = vpop.permute.xlu0 %1922 }
0x1168   : > { %v1928_v31 = vmul.f32 %v1923_v35, %v1866_v2 }
0x116a   : > { %v2510_v11 = vpop.eup %2509 }
0x116b   : > { %v1852_v25 = vadd.f32 1.0, %v2510_v11 }
0x116d   : > { %2511 = vrcp.f32 %v1852_v25  ;;  %v1879_v12 = vand.u32 2147483648, %v1852_v25  ;;  %v1877_v15 = vand.u32 2147483647, %v1852_v25  ;;  %vm1873_vm11 = vweird.f32 %v1852_v25 }
0x116f   : > { %v1880_v16 = vor.u32 1.1754944e-38, %v1879_v12  ;;  %vm1878_vm13 = vcmp.eq.f32.partialorder %v1877_v15, 8.507059e+37 }
0x1173   : > { %v2512_v26 = vpop.eup %2511 }
0x1174   : > { %v1869_v23 = vmul.f32 %v2512_v26, %v1852_v25  ;;  %vm1874_vm10 = vweird.f32 %v2512_v26 }
0x1175   : > { %vm1875_vm12 = vmor %vm1873_vm11, %vm1874_vm10 }
0x1176   : > { %v1870_v40 = vsub.f32 1.0, %v1869_v23 }
0x1178   : > { %v1871_v14 = vmul.f32 %v2512_v26, %v1870_v40 }
0x117a   : > { %v1872_v19 = vadd.f32 %v2512_v26, %v1871_v14 }
0x117c   : > { %v1876_v17 = vsel %vm1875_vm12, %v2512_v26, %v1872_v19 }
0x117d   : > { %v1881_v21 = vsel %vm1878_vm13, %v1880_v16, %v1876_v17 }
0x117e   : > { %v1884_v38 = vmul.f32 %v1881_v21, %v1801_v18  ;;  %v1931_v5 = vsub.f32 1.0, %v1881_v21 }
0x1180   : > { %1889 = vrot.lane.b32.xlu2 %v1884_v38, %s2632_s10 }
0x1188   : > { %1924 = vrot.lane.b32.xlu2 %v1801_v18, %s2631_s18 }
0x118a   : > { %v1888_v22 = vpop.permute.xlu1 %1887 }
0x118b   : > { %2340 = vmatmul.msk.f32.vlgmr.msra.gmra.mxu0 %vm452_vm1, %v1888_v22 }
0x11da   : > { %v1890_v24 = vpop.permute.xlu2 %1889 }
0x11db   : > { %2341 = vmatmul.msk.f32.gmra.mxu0 %vm452_vm1, %v1890_v24 }
0x11e2   : > { %v1925_v4 = vpop.permute.xlu2 %1924 }
0x11e3   : > { %v1929_v44 = vmul.f32 %v1925_v4, %v1881_v21 }
0x1208   : > { %v1912_v27 = vpop.f32.mrf.mxu0 }
0x1209   : > { %v1918_v9 = vadd.f32 %v1912_v27, %v2855_v59 }
0x120b   : > { %2513 = vtanh.f32 %v1918_v9 }
0x1211   : > { %v2514_v60 = vpop.eup %2513 }
0x1212   : > { %1934 = vrot.lane.b32.xlu1 %v2514_v60, %s2630_s17 }
0x1258   : > { %v1915_v32 = vpop.f32.mrf.mxu0 }
0x1259   : > { %v1919_v49 = vadd.f32 %v1915_v32, %v2871_v7 }
0x125b   : > { %2515 = vtanh.f32 %v1919_v49 }
0x1261   : > { %v2516_v20 = vpop.eup %2515 }
0x1262   : > { %1936 = vrot.lane.b32.xlu0 %v2516_v20, %s2630_s17 }
0x1284   : > { %v1935_v42 = vpop.permute.xlu1 %1934 }
0x1285   : > { %v1940_v39 = vmul.f32 %v1935_v42, %v1930_v28 }
0x1287   : > { %v1942_v41 = vadd.f32 %v1940_v39, %v1928_v31 }
0x1289   : > { %1946 = vrot.lane.b32.xlu1 %v1942_v41, %s2630_s17 }
0x12d4   : > { %v1937_v8 = vpop.permute.xlu0 %1936 }
0x12d5   : > { %v1941_v13 = vmul.f32 %v1937_v8, %v1931_v5  ;;  %v2122_v8 = vld [vmem:[%s3223_s6] sm:$0x3] }
0x12d7   : > { %v1943_v46 = vadd.f32 %v1941_v13, %v1929_v44 }
0x12d9   : > { %1948 = vrot.lane.b32.xlu2 %v1943_v46, %s2630_s17 }
0x12fb   : > { %v1947_v30 = vpop.permute.xlu1 %1946 }
0x12fc   : > { %2342 = vmatmul.msk.f32.vlgmr.msra.gmra.mxu1 %vm452_vm1, %v1947_v30  ;;  %v2124_v30 = vperm.slane %v2122_v8, 0 }
0x1333   : > { %v1949_v43 = vpop.permute.xlu2 %1948 }
0x1334   : > { %2343 = vmatmul.msk.f32.gmra.mxu1 %vm452_vm1, %v1949_v43  ;;  %v2125_v43 = vperm.slane %v2122_v8, 1 }
0x1379   : > { %v1971_v48 = vpop.f32.mrf.mxu1 }
0x137a   : > { %1979 = vrot.lane.b32.xlu0 %v1971_v48, %s2632_s10 }
0x13b1   : > { %v1974_v37 = vpop.f32.mrf.mxu1 }
0x13b2   : > { %1981 = vrot.lane.b32.xlu1 %v1974_v37, %s2632_s10 }
0x13ec   : > { %v1980_v50 = vpop.permute.xlu0 %1979 }
0x13ed   : > { %v1985_v18 = vadd.f32 %v1980_v50, %v2855_v59 }
0x13ef   : > { %v2344_v45 = vmul.f32 -1.442695, %v1985_v18 }
0x13f1   : > { %2517 = vpow2.f32 %v2344_v45 }
0x13f7   : > { %v2518_v33 = vpop.eup %2517 }
0x13f8   : > { %v1993_v51 = vadd.f32 1.0, %v2518_v33 }
0x13fa   : > { %2519 = vrcp.f32 %v1993_v51  ;;  %v2006_v53 = vand.u32 2147483648, %v1993_v51  ;;  %v2004_v47 = vand.u32 2147483647, %v1993_v51  ;;  %vm2000_vm15 = vweird.f32 %v1993_v51 }
0x13fc   : > { %v2007_v56 = vor.u32 1.1754944e-38, %v2006_v53  ;;  %vm2005_vm2 = vcmp.eq.f32.partialorder %v2004_v47, 8.507059e+37 }
0x1400   : > { %v2520_v29 = vpop.eup %2519 }
0x1401   : > { %v1996_v36 = vmul.f32 %v2520_v29, %v1993_v51  ;;  %vm2001_vm14 = vweird.f32 %v2520_v29 }
0x1402   : > { %vm2002_vm0 = vmor %vm2000_vm15, %vm2001_vm14 }
0x1403   : > { %v1997_v52 = vsub.f32 1.0, %v1996_v36 }
0x1405   : > { %v1998_v54 = vmul.f32 %v2520_v29, %v1997_v52 }
0x1407   : > { %v1999_v55 = vadd.f32 %v2520_v29, %v1998_v54 }
0x1409   : > { %v2003_v57 = vsel %vm2002_vm0, %v2520_v29, %v1999_v55 }
0x140a   : > { %v2008_v58 = vsel %vm2005_vm2, %v2007_v56, %v2003_v57 }
0x140b   : > { %v2025_v61 = vmul.f32 %v2008_v58, %v1942_v41  ;;  %v2080_v32 = vsub.f32 1.0, %v2008_v58 }
0x140d   : > { %2029 = vrot.lane.b32.xlu2 %v2025_v61, %s2630_s17 }
0x1424   : > { %v1982_v62 = vpop.permute.xlu1 %1981 }
0x1425   : > { %v1986_v63 = vadd.f32 %v1982_v62, %v2871_v7 }
0x1427   : > { %v2345_v0 = vmul.f32 -1.442695, %v1986_v63 }
0x1429   : > { %2521 = vpow2.f32 %v2345_v0 }
0x142f   : > { %v2522_v1 = vpop.eup %2521 }
0x1430   : > { %v1994_v2 = vadd.f32 1.0, %v2522_v1 }
0x1432   : > { %2523 = vrcp.f32 %v1994_v2  ;;  %v2021_v10 = vand.u32 2147483648, %v1994_v2  ;;  %v2019_v25 = vand.u32 2147483647, %v1994_v2  ;;  %vm2015_vm4 = vweird.f32 %v1994_v2 }
0x1434   : > { %v2022_v23 = vor.u32 1.1754944e-38, %v2021_v10  ;;  %vm2020_vm6 = vcmp.eq.f32.partialorder %v2019_v25, 8.507059e+37 }
0x1438   : > { %v2524_v34 = vpop.eup %2523 }
0x1439   : > { %v2011_v3 = vmul.f32 %v2524_v34, %v1994_v2  ;;  %vm2016_vm3 = vweird.f32 %v2524_v34 }
0x143a   : > { %vm2017_vm5 = vmor %vm2015_vm4, %vm2016_vm3 }
0x143b   : > { %v2012_v6 = vsub.f32 1.0, %v2011_v3 }
0x143d   : > { %v2013_v11 = vmul.f32 %v2524_v34, %v2012_v6 }
0x143f   : > { %v2014_v26 = vadd.f32 %v2524_v34, %v2013_v11 }
0x1441   : > { %v2018_v40 = vsel %vm2017_vm5, %v2524_v34, %v2014_v26 }
0x1442   : > { %v2023_v12 = vsel %vm2020_vm6, %v2022_v23, %v2018_v40 }
0x1443   : > { %v2026_v14 = vmul.f32 %v2023_v12, %v1943_v46  ;;  %v2081_v42 = vsub.f32 1.0, %v2023_v12 }
0x1445   : > { %2031 = vrot.lane.b32.xlu0 %v2026_v14, %s2630_s17 }
0x144d   : > { %2072 = vrot.lane.b32.xlu0 %v1942_v41, %s2631_s18 }
0x1467   : > { %v2030_v15 = vpop.permute.xlu2 %2029 }
0x1468   : > { %2346 = vmatmul.msk.f32.vlgmr.msra.gmra.mxu2 %vm452_vm1, %v2030_v15 }
0x14b7   : > { %v2032_v19 = vpop.permute.xlu0 %2031 }
0x14b8   : > { %2347 = vmatmul.msk.f32.gmra.mxu2 %vm452_vm1, %v2032_v19 }
0x14bf   : > { %v2073_v60 = vpop.permute.xlu0 %2072 }
0x14c0   : > { %v2078_v20 = vmul.f32 %v2073_v60, %v2008_v58 }
0x14eb   : > { %v2054_v16 = vpop.f32.mrf.mxu2 }
0x14ec   : > { %2062 = vrot.lane.b32.xlu1 %v2054_v16, %s2631_s18 }
0x14f4   : > { %2074 = vrot.lane.b32.xlu1 %v1943_v46, %s2631_s18  ;;  %v2132_v46 = vld [vmem:[%s3224_s7] sm:$0x3] }
0x14f5   : > { %v2134_v37 = vperm.slane %v2132_v46, 0  ;;  %v2135_v50 = vperm.slane %v2132_v46, 1 }
0x153b   : > { %v2057_v17 = vpop.f32.mrf.mxu2 }
0x153c   : > { %2064 = vrot.lane.b32.xlu2 %v2057_v17, %s2631_s18 }
0x155e   : > { %v2063_v21 = vpop.permute.xlu1 %2062 }
0x155f   : > { %v2068_v38 = vadd.f32 %v2063_v21, %v2855_v59 }
0x1561   : > { %2525 = vtanh.f32 %v2068_v38 }
0x1566   : > { %v2075_v59 = vpop.permute.xlu1 %2074 }
0x1567   : > { %v2526_v22 = vpop.eup %2525  ;;  %v2079_v39 = vmul.f32 %v2075_v59, %v2023_v12 }
0x1568   : > { %2084 = vrot.lane.b32.xlu2 %v2526_v22, %s2630_s17 }
0x1596   : > { %v2065_v24 = vpop.permute.xlu2 %2064 }
0x1597   : > { %v2069_v27 = vadd.f32 %v2065_v24, %v2871_v7 }
0x1599   : > { %2527 = vtanh.f32 %v2069_v27 }
0x159f   : > { %v2528_v9 = vpop.eup %2527 }
0x15a0   : > { %2086 = vrot.lane.b32.xlu0 %v2528_v9, %s2630_s17 }
0x15c2   : > { %v2085_v49 = vpop.permute.xlu2 %2084 }
0x15c3   : > { %v2090_v35 = vmul.f32 %v2085_v49, %v2080_v32 }
0x15c5   : > { %v2092_v28 = vadd.f32 %v2090_v35, %v2078_v20 }
0x15c7   : > { %2102 = vrot.lane.b32.xlu0 %v2092_v28, %s2632_s10  ;;  %2096 = vrot.lane.b32.xlu1 %v2092_v28, %s2631_s18 }
0x1612   : > { %v2087_v31 = vpop.permute.xlu0 %2086 }
0x1613   : > { %v2091_v7 = vmul.f32 %v2087_v31, %v2081_v42 }
0x1615   : > { %v2093_v41 = vadd.f32 %v2091_v7, %v2079_v39 }
0x1617   : > { %2110 = vrot.lane.b32.xlu0 %v2093_v41, %s2630_s17  ;;  %2104 = vrot.lane.b32.xlu1 %v2093_v41, %s2632_s10  ;;  %s2161_s10 = sshll.u32 %s2158_s25, 4  ;;  %s2162_s10 = int_to_ptr.hbm [resolvable:$true] %s2161_s10 }
0x1618   : > { %2098 = vrot.lane.b32.xlu2 %v2093_v41, %s2631_s18  ;;  %s2573_s12 = sshra.s32 %s2162_s10, 4  ;;  %s2574_s12 = int_to_ptr.hbm [resolvable:$true] %s2573_s12 }
0x1619   : > { %s2575_s13 = scalar_lea.hbm %s2574_s12, 32  ;;  %p2580_p3 = scmp.lt.s32.totalorder %s2574_s12, %s3225_s8 }
0x161a   : > { %p2576_p0 = scmp.ne.s32.totalorder %s2574_s12, %s2575_s13 }
0x161c   : > { %p2577_p1 = pnand %p2576_p0, %p2718_p5 }
0x161e   : > { %p2578_p2 = pneg %p2577_p1 }
0x1620   : > { %2108 = vrot.lane.b32.xlu2 %v2092_v28, %s2630_s17  ;;  %s2254_s17 = sshll.u32 %s328_s19, 5 }
0x1621   : > { %s330_s18 = scalar_lea.vmem [#allocation5], %s2254_s17  ;;  %s2579_s17 = scalar_lea.hbm %s3225_s8, 64 }
0x1622   : > { %s2159_s26 = sshll.u32 %s330_s18, 4  ;;  %p2581_p4 = scmp.lt.s32.totalorder %s2579_s17, %s2575_s13  ;;  %s2160_s26 = int_to_ptr.vmem [resolvable:$true] %s2159_s26 }
0x1624   : > { %p2582_p7 = por %p2581_p4, %p2580_p3 }
0x1626   : > { %p2583_p8 = pnand %p2582_p7, %p2578_p2 }
0x1639   : > { %v2097_v5 = vpop.permute.xlu1 %2096  ;;  %v2103_v13 = vpop.permute.xlu0 %2102 }
0x163a   : > { %v2114_v44 = vsel %vm452_vm1, %v2097_v5, %v2092_v28 }
0x163b   : > { %v2117_v48 = vsel %vm2116_vm7, %v2114_v44, %v2103_v13 }
0x1672   : > { %v2099_v4 = vpop.permute.xlu2 %2098 }
0x1673   : > { %v2115_v52 = vsel %vm452_vm1, %v2099_v4, %v2093_v41 }
0x167a   : > { %v2109_v18 = vpop.permute.xlu2 %2108 }
0x167b   : > { %v2120_v45 = vsel %vm2119_vm8, %v2117_v48, %v2109_v18 }
0x167c   : > { %v2128_v33 = vmul.f32 %v2124_v30, %v2120_v45  ;;  %v2129_v51 = vmul.f32 %v2125_v43, %v2120_v45 }
0x167e   : > { %v2138_v29 = vadd.f32 %v2134_v37, %v2128_v33  ;;  %v2139_v36 = vadd.f32 %v2135_v50, %v2129_v51 }
0x1680   : > { %2142 = vst [vmem:[%s330_s18] sm:$0xff] %v2138_v29 }
0x1681   : > { %2143 = vst [vmem:[%s330_s18 + $0x8] sm:$0xff] %v2139_v36 }
0x1689   : > { %v2105_v53 = vpop.permute.xlu1 %2104  ;;  %v2111_v54 = vpop.permute.xlu0 %2110 }
0x168a   : > { %v2118_v47 = vsel %vm2116_vm7, %v2115_v52, %v2105_v53 }
0x168b   : > { %v2121_v55 = vsel %vm2119_vm8, %v2118_v47, %v2111_v54 }
0x168c   : > { %v2130_v56 = vmul.f32 %v2124_v30, %v2121_v55  ;;  %v2131_v57 = vmul.f32 %v2125_v43, %v2121_v55 }
0x168e   : > { %v2140_v58 = vadd.f32 %v2134_v37, %v2130_v56  ;;  %v2141_v61 = vadd.f32 %v2135_v50, %v2131_v57 }
0x1690   : > { %2144 = vst [vmem:[%s330_s18 + $0x10] sm:$0xff] %v2140_v58 }
0x1691   : > { %2145 = vst [vmem:[%s330_s18 + $0x18] sm:$0xff] %v2141_v61 }
0x1692   : > { %2586 = shalt.err (!%p2583_p8)
}
0x1693   : > { %s2633_s19 = smov 256   ;;  %s2634_s18 = smov 16  }
0x1694   : > { %2364 = dma.vmem_to_hbm [thread:$0]  (%p2718_p5), %s2160_s26, 512, %s2162_s10, %s2147_s9, %s2633_s19, %s2633_s19, %s2634_s18  }
0x1695 PF: > { %p2376_p9 = scmp.ge.s32.totalorder %s2625_s30, 2  ;;  %s2176_s24 = sand.u32 1, %s2613_s27  }
0x1696   : > { %s2177_s25 = scalar_lea.sflag [#allocation4], %s2176_s24 }
0x1697   : > { %p2371_p10 = pnand %p2376_p9, %p2722_p6 }
0x1699   : > { %p2372_p11 = pneg %p2371_p10 }
0x169b   : > { %2608 = dma.done.wait (%p2372_p11), %s2177_s25, 512  }
0x169c   : > { %2610 = vsyncadd (%p2372_p11), %s2177_s25, 4294966784  ;;  %p19_p12 = scmp.ge.s32.totalorder %s2705_s11, 4   ;;  %s3228_s27 = smov %s2617_s28 }
0x169d   : > { %s3229_s28 = smov %s2621_s29  ;;  %s3230_s29 = smov %s2716_s14 }
0x169e   : > { %s3231_s30 = smov %s2705_s11  ;;  %21 = sbr.rel (!%p19_p12) target bundleno = 4 (0x4), region = 97 }
0x16a3   :  { %2183 = vsyncpa [#allocation3], 1 }
0x16a4   :  { %2185 = vsyncpa [#allocation3 + $0x1], 1 }
0x16a5   :  { %2186 = vsyncpa [#allocation4], 1 }
0x16a6   :  { %2188 = vsyncpa [#allocation4 + $0x1], 1 }

</bundles_post_ra>
